<compile_context>
chip_gen: v7x
topology: tpu7x:2x2x1
jax: 0.10.0
libtpu: 0.0.40
codegen_flags: <defaults>
</compile_context>

<pallas_src>
import jax
import jax.numpy as jnp
import numpy as np
from jax import lax
from jax.experimental import pallas as pl


def _round_up(x, m):
    return (x + m - 1) // m * m


def gru_recurrence_kernel(xproj_ref, whh_ref, bhn_ref, out_ref):
    """Serial GRU recurrence over the whole sequence in one kernel invocation.

    xproj_ref: (S, Bp, 3*Hp) f32  precomputed x@W_i + fused biases, blocks [r|z|n]
    whh_ref:   (Hp, 3*Hp)   bf16  fused hidden-side weight [W_hr | W_hz | W_hn]
    bhn_ref:   (1, Hp)      f32   hidden bias of 'n' gate (gated by r -> not foldable)
    out_ref:   (S, Bp, Hp)  f32   per-step hidden states (lane-dense slab)
    """
    S, Bp, Hp = out_ref.shape

    # Loop-invariant values: read/broadcast ONCE (JAX does not CSE
    # broadcast_in_dim, and the weight must not be re-materialized per step).
    whh = whh_ref[...]                                    # (Hp, 3Hp) bf16
    bhn = jnp.broadcast_to(bhn_ref[...], (Bp, Hp))        # (Bp, Hp)  f32

    def step(t, h):
        # Single fused bf16 MXU push per step, f32 accumulation.
        gh = jnp.dot(h.astype(jnp.bfloat16), whh,
                     preferred_element_type=jnp.float32)   # (Bp, 3Hp)
        gx = xproj_ref[t]                                   # (Bp, 3Hp)

        # PyTorch GRU (gate order r, z, n); input-side terms + non-gated biases
        # are already folded into gx.
        r = jax.nn.sigmoid(gx[:, 0:Hp] + gh[:, 0:Hp])
        z = jax.nn.sigmoid(gx[:, Hp:2 * Hp] + gh[:, Hp:2 * Hp])
        n = jnp.tanh(gx[:, 2 * Hp:3 * Hp] + r * (gh[:, 2 * Hp:3 * Hp] + bhn))
        h_new = (1.0 - z) * n + z * h

        out_ref[t] = h_new.astype(out_ref.dtype)
        return h_new                                        # h stays in vregs

    h0 = jnp.zeros((Bp, Hp), jnp.float32)
    lax.fori_loop(0, S, step, h0, unroll=min(int(S), 8))


def gru_encoder_pallas(x_emb, w_ih, w_hh, b_ih, b_hh):
    """x_emb: (S, B, E) float32; weights in PyTorch GRU layout:
       w_ih (3H, E), w_hh (3H, H), b_ih (3H,), b_hh (3H,).
       Returns (output (S,B,H), state (1,B,H)) like Seq2SeqEncoder.forward."""
    S, B, E = x_emb.shape
    H = w_hh.shape[1]
    Hp = _round_up(H, 128)   # lane-dense hidden dim
    Bp = _round_up(B, 8)     # sublane-aligned batch
    G = 3 * Hp

    # --- split packed PyTorch gate params (order r, z, n) -------------------
    wir, wiz, win = w_ih[0:H], w_ih[H:2 * H], w_ih[2 * H:3 * H]          # (H, E)
    whr, whz, whn = w_hh[0:H], w_hh[H:2 * H], w_hh[2 * H:3 * H]          # (H, H)
    bir, biz, bin_ = b_ih[0:H], b_ih[H:2 * H], b_ih[2 * H:3 * H]
    bhr, bhz, bhn = b_hh[0:H], b_hh[H:2 * H], b_hh[2 * H:3 * H]

    # Padding stays explicitly zero (required: padded lanes feed r*(gh+b_hn)).
    padHc = lambda m: jnp.pad(m, ((0, 0), (0, Hp - H)))      # pad gate-output cols
    padHv = lambda v: jnp.pad(v, (0, Hp - H))
    padHH = lambda m: jnp.pad(m, ((0, Hp - H), (0, Hp - H)))

    # --- hoisted input projection: one big parallel matmul outside the serial
    #     loop (all non-r-gated biases folded in).  Batch is padded BEFORE the
    #     matmul so the padded slab is produced directly; default MXU precision.
    x_emb_p = jnp.pad(x_emb, ((0, 0), (0, Bp - B), (0, 0))).astype(jnp.float32)
    wi_cat = jnp.concatenate([padHc(wir.T), padHc(wiz.T), padHc(win.T)], axis=1)   # (E, 3Hp)
    bias_cat = jnp.concatenate([padHv(bir + bhr), padHv(biz + bhz), padHv(bin_)])  # (3Hp,)
    xproj = (jnp.dot(x_emb_p.reshape(S * Bp, E), wi_cat) + bias_cat)
    xproj = xproj.reshape(S, Bp, G).astype(jnp.float32)

    # --- fused hidden-side weight (bf16 MXU feed) + remaining (gated) bias ---
    whh_cat = jnp.concatenate([padHH(whr.T), padHH(whz.T), padHH(whn.T)],
                              axis=1).astype(jnp.bfloat16)                          # (Hp, 3Hp)
    bhn_p = padHv(bhn)[None, :].astype(jnp.float32)                                 # (1, Hp)

    # Whole (small) problem fits VMEM -> no grid, no pipelining, no
    # double-buffering; the time loop lives inside the kernel.
    # TODO(synk): keep output f32 here; switch to bf16 if the downstream
    # decoder accepts it (pure bandwidth/VMEM savings).
    out_p = pl.pallas_call(
        gru_recurrence_kernel,
        out_shape=jax.ShapeDtypeStruct((S, Bp, Hp), jnp.float32),
    )(xproj, whh_cat, bhn_p)

    out = out_p[:, :B, :H]          # strip batch / hidden padding
    state = out[-1][None, :, :]     # (num_layers=1, B, H) final hidden state
    return out, state


def gru_encoder_ref(x_emb, w_ih, w_hh, b_ih, b_hh):
    """Pure-JAX reference (lax.scan, full f32 precision) for correctness check."""
    S, B, E = x_emb.shape
    H = w_hh.shape[1]

    def step(h, x):
        gi = jnp.dot(x, w_ih.T, precision=lax.Precision.HIGHEST) + b_ih
        gh = jnp.dot(h, w_hh.T, precision=lax.Precision.HIGHEST) + b_hh
        i_r, i_z, i_n = gi[:, :H], gi[:, H:2 * H], gi[:, 2 * H:]
        h_r, h_z, h_n = gh[:, :H], gh[:, H:2 * H], gh[:, 2 * H:]
        r = jax.nn.sigmoid(i_r + h_r)
        z = jax.nn.sigmoid(i_z + h_z)
        n = jnp.tanh(i_n + r * h_n)
        h_new = (1.0 - z) * n + z * h
        return h_new, h_new

    h0 = jnp.zeros((B, H), jnp.float32)
    h_last, outs = lax.scan(step, h0, x_emb)
    return outs, h_last[None]


if __name__ == "__main__":
    key = jax.random.PRNGKey(0)
    k_tok, k_emb, k_wih, k_whh, k_bih, k_bhh = jax.random.split(key, 6)

    # Small deterministic config.
    vocab_size, embed_size, num_hiddens = 32, 16, 32
    batch, seq = 2, 8

    # Deterministic synthetic parameters (not a checkpoint).
    embedding = jax.random.normal(k_emb, (vocab_size, embed_size), jnp.float32) * 0.1
    w_ih = jax.random.normal(k_wih, (3 * num_hiddens, embed_size), jnp.float32) * 0.1
    w_hh = jax.random.normal(k_whh, (3 * num_hiddens, num_hiddens), jnp.float32) * 0.1
    b_ih = jax.random.normal(k_bih, (3 * num_hiddens,), jnp.float32) * 0.1
    b_hh = jax.random.normal(k_bhh, (3 * num_hiddens,), jnp.float32) * 0.1

    # Input token ids: (batch, seq), like the PyTorch forward's X.
    X = jax.random.randint(k_tok, (batch, seq), 0, vocab_size, jnp.int32)

    # Glue: embedding lookup + permute to seq-major (seq, batch, embed).
    x_emb = jnp.transpose(embedding[X], (1, 0, 2)).astype(jnp.float32)

    out, state = gru_encoder_pallas(x_emb, w_ih, w_hh, b_ih, b_hh)
    out = jax.block_until_ready(out)
    state = jax.block_until_ready(state)

    ref_out, ref_state = gru_encoder_ref(x_emb, w_ih, w_hh, b_ih, b_hh)
    # bf16 weight feed + default MXU precision -> tolerance loosened from 1e-5.
    np.testing.assert_allclose(np.asarray(out), np.asarray(ref_out), rtol=1e-2, atol=1e-2)
    np.testing.assert_allclose(np.asarray(state), np.asarray(ref_state), rtol=1e-2, atol=1e-2)

    print("KERNEL_OK")
</pallas_src>

<mosaic_0001>
module attributes {stable_mosaic.version = 11 : i64} {
  func.func @gru_recurrence_kernel(%arg0: memref<8x8x384xf32, #tpu.memory_space<vmem>>, %arg1: memref<128x384xbf16, #tpu.memory_space<vmem>>, %arg2: memref<1x128xf32, #tpu.memory_space<vmem>>, %arg3: memref<8x8x128xf32, #tpu.memory_space<vmem>>) attributes {dimension_semantics = [], scalar_prefetch = 0 : i64, scratch_operands = 0 : i64, tpu.core_type = #tpu.core_type<tc>} {
    %c0 = arith.constant 0 : index
    %c0_0 = arith.constant 0 : index
    %0 = vector.load %arg1[%c0, %c0_0] : memref<128x384xbf16, #tpu.memory_space<vmem>>, vector<128x384xbf16>
    %c0_1 = arith.constant 0 : index
    %c0_2 = arith.constant 0 : index
    %1 = vector.load %arg2[%c0_1, %c0_2] : memref<1x128xf32, #tpu.memory_space<vmem>>, vector<1x128xf32>
    %2 = vector.shape_cast %1 : vector<1x128xf32> to vector<1x128xf32>
    %3 = vector.broadcast %2 : vector<1x128xf32> to vector<8x128xf32>
    %cst = arith.constant 0.000000e+00 : f32
    %4 = vector.broadcast %cst : f32 to vector<8x128xf32>
    %c0_i32 = arith.constant 0 : i32
    %5 = arith.truncf %4 : vector<8x128xf32> to vector<8x128xbf16>
    %cst_3 = arith.constant dense<0.000000e+00> : vector<8x384xf32>
    %6 = tpu.matmul %5, %0, %cst_3 {dimension_numbers = #tpu.dot_dimension_numbers<[1], [0], [0], [1], [0, 0, 1, 1], [], []>} : vector<8x128xbf16>, vector<128x384xbf16>, vector<8x384xf32> -> vector<8x384xf32>
    %7 = arith.index_cast %c0_i32 : i32 to index
    %c0_4 = arith.constant 0 : index
    %c0_5 = arith.constant 0 : index
    %8 = vector.load %arg0[%7, %c0_4, %c0_5] : memref<8x8x384xf32, #tpu.memory_space<vmem>>, vector<1x8x384xf32>
    %9 = vector.shape_cast %8 : vector<1x8x384xf32> to vector<8x384xf32>
    %10 = vector.extract_strided_slice %9 {offsets = [0, 0], sizes = [8, 128], strides = [1, 1]} : vector<8x384xf32> to vector<8x128xf32>
    %11 = vector.extract_strided_slice %6 {offsets = [0, 0], sizes = [8, 128], strides = [1, 1]} : vector<8x384xf32> to vector<8x128xf32>
    %12 = arith.addf %10, %11 : vector<8x128xf32>
    %13 = arith.negf %12 : vector<8x128xf32>
    %14 = math.exp %13 : vector<8x128xf32>
    %cst_6 = arith.constant 1.000000e+00 : f32
    %15 = vector.broadcast %cst_6 : f32 to vector<8x128xf32>
    %16 = arith.addf %15, %14 : vector<8x128xf32>
    %17 = arith.divf %15, %16 : vector<8x128xf32>
    %18 = vector.extract_strided_slice %9 {offsets = [0, 128], sizes = [8, 128], strides = [1, 1]} : vector<8x384xf32> to vector<8x128xf32>
    %19 = vector.extract_strided_slice %6 {offsets = [0, 128], sizes = [8, 128], strides = [1, 1]} : vector<8x384xf32> to vector<8x128xf32>
    %20 = arith.addf %18, %19 : vector<8x128xf32>
    %21 = arith.negf %20 : vector<8x128xf32>
    %22 = math.exp %21 : vector<8x128xf32>
    %cst_7 = arith.constant 1.000000e+00 : f32
    %23 = vector.broadcast %cst_7 : f32 to vector<8x128xf32>
    %24 = arith.addf %23, %22 : vector<8x128xf32>
    %25 = arith.divf %23, %24 : vector<8x128xf32>
    %26 = vector.extract_strided_slice %9 {offsets = [0, 256], sizes = [8, 128], strides = [1, 1]} : vector<8x384xf32> to vector<8x128xf32>
    %27 = vector.extract_strided_slice %6 {offsets = [0, 256], sizes = [8, 128], strides = [1, 1]} : vector<8x384xf32> to vector<8x128xf32>
    %28 = arith.addf %27, %3 : vector<8x128xf32>
    %29 = arith.mulf %17, %28 : vector<8x128xf32>
    %30 = arith.addf %26, %29 : vector<8x128xf32>
    %31 = math.tanh %30 : vector<8x128xf32>
    %cst_8 = arith.constant 1.000000e+00 : f32
    %32 = vector.broadcast %cst_8 : f32 to vector<8x128xf32>
    %33 = arith.subf %32, %25 : vector<8x128xf32>
    %34 = arith.mulf %33, %31 : vector<8x128xf32>
    %35 = arith.mulf %25, %4 : vector<8x128xf32>
    %36 = arith.addf %34, %35 : vector<8x128xf32>
    %37 = arith.index_cast %c0_i32 : i32 to index
    %c0_9 = arith.constant 0 : index
    %c0_10 = arith.constant 0 : index
    %38 = vector.load %arg3[%37, %c0_9, %c0_10] : memref<8x8x128xf32, #tpu.memory_space<vmem>>, vector<1x8x128xf32>
    %39 = vector.shape_cast %38 : vector<1x8x128xf32> to vector<8x128xf32>
    %40 = vector.shape_cast %36 : vector<8x128xf32> to vector<1x8x128xf32>
    tpu.vector_store %arg3[%37, %c0_9, %c0_10], %40 {strides = array<i32>} : memref<8x8x128xf32, #tpu.memory_space<vmem>>, vector<1x8x128xf32>,
    %c1_i32 = arith.constant 1 : i32
    %41 = arith.truncf %36 : vector<8x128xf32> to vector<8x128xbf16>
    %cst_11 = arith.constant dense<0.000000e+00> : vector<8x384xf32>
    %42 = tpu.matmul %41, %0, %cst_11 {dimension_numbers = #tpu.dot_dimension_numbers<[1], [0], [0], [1], [0, 0, 1, 1], [], []>} : vector<8x128xbf16>, vector<128x384xbf16>, vector<8x384xf32> -> vector<8x384xf32>
    %43 = arith.index_cast %c1_i32 : i32 to index
    %c0_12 = arith.constant 0 : index
    %c0_13 = arith.constant 0 : index
    %44 = vector.load %arg0[%43, %c0_12, %c0_13] : memref<8x8x384xf32, #tpu.memory_space<vmem>>, vector<1x8x384xf32>
    %45 = vector.shape_cast %44 : vector<1x8x384xf32> to vector<8x384xf32>
    %46 = vector.extract_strided_slice %45 {offsets = [0, 0], sizes = [8, 128], strides = [1, 1]} : vector<8x384xf32> to vector<8x128xf32>
    %47 = vector.extract_strided_slice %42 {offsets = [0, 0], sizes = [8, 128], strides = [1, 1]} : vector<8x384xf32> to vector<8x128xf32>
    %48 = arith.addf %46, %47 : vector<8x128xf32>
    %49 = arith.negf %48 : vector<8x128xf32>
    %50 = math.exp %49 : vector<8x128xf32>
    %cst_14 = arith.constant 1.000000e+00 : f32
    %51 = vector.broadcast %cst_14 : f32 to vector<8x128xf32>
    %52 = arith.addf %51, %50 : vector<8x128xf32>
    %53 = arith.divf %51, %52 : vector<8x128xf32>
    %54 = vector.extract_strided_slice %45 {offsets = [0, 128], sizes = [8, 128], strides = [1, 1]} : vector<8x384xf32> to vector<8x128xf32>
    %55 = vector.extract_strided_slice %42 {offsets = [0, 128], sizes = [8, 128], strides = [1, 1]} : vector<8x384xf32> to vector<8x128xf32>
    %56 = arith.addf %54, %55 : vector<8x128xf32>
    %57 = arith.negf %56 : vector<8x128xf32>
    %58 = math.exp %57 : vector<8x128xf32>
    %cst_15 = arith.constant 1.000000e+00 : f32
    %59 = vector.broadcast %cst_15 : f32 to vector<8x128xf32>
    %60 = arith.addf %59, %58 : vector<8x128xf32>
    %61 = arith.divf %59, %60 : vector<8x128xf32>
    %62 = vector.extract_strided_slice %45 {offsets = [0, 256], sizes = [8, 128], strides = [1, 1]} : vector<8x384xf32> to vector<8x128xf32>
    %63 = vector.extract_strided_slice %42 {offsets = [0, 256], sizes = [8, 128], strides = [1, 1]} : vector<8x384xf32> to vector<8x128xf32>
    %64 = arith.addf %63, %3 : vector<8x128xf32>
    %65 = arith.mulf %53, %64 : vector<8x128xf32>
    %66 = arith.addf %62, %65 : vector<8x128xf32>
    %67 = math.tanh %66 : vector<8x128xf32>
    %cst_16 = arith.constant 1.000000e+00 : f32
    %68 = vector.broadcast %cst_16 : f32 to vector<8x128xf32>
    %69 = arith.subf %68, %61 : vector<8x128xf32>
    %70 = arith.mulf %69, %67 : vector<8x128xf32>
    %71 = arith.mulf %61, %36 : vector<8x128xf32>
    %72 = arith.addf %70, %71 : vector<8x128xf32>
    %73 = arith.index_cast %c1_i32 : i32 to index
    %c0_17 = arith.constant 0 : index
    %c0_18 = arith.constant 0 : index
    %74 = vector.load %arg3[%73, %c0_17, %c0_18] : memref<8x8x128xf32, #tpu.memory_space<vmem>>, vector<1x8x128xf32>
    %75 = vector.shape_cast %74 : vector<1x8x128xf32> to vector<8x128xf32>
    %76 = vector.shape_cast %72 : vector<8x128xf32> to vector<1x8x128xf32>
    tpu.vector_store %arg3[%73, %c0_17, %c0_18], %76 {strides = array<i32>} : memref<8x8x128xf32, #tpu.memory_space<vmem>>, vector<1x8x128xf32>,
    %c2_i32 = arith.constant 2 : i32
    %77 = arith.truncf %72 : vector<8x128xf32> to vector<8x128xbf16>
    %cst_19 = arith.constant dense<0.000000e+00> : vector<8x384xf32>
    %78 = tpu.matmul %77, %0, %cst_19 {dimension_numbers = #tpu.dot_dimension_numbers<[1], [0], [0], [1], [0, 0, 1, 1], [], []>} : vector<8x128xbf16>, vector<128x384xbf16>, vector<8x384xf32> -> vector<8x384xf32>
    %79 = arith.index_cast %c2_i32 : i32 to index
    %c0_20 = arith.constant 0 : index
    %c0_21 = arith.constant 0 : index
    %80 = vector.load %arg0[%79, %c0_20, %c0_21] : memref<8x8x384xf32, #tpu.memory_space<vmem>>, vector<1x8x384xf32>
    %81 = vector.shape_cast %80 : vector<1x8x384xf32> to vector<8x384xf32>
    %82 = vector.extract_strided_slice %81 {offsets = [0, 0], sizes = [8, 128], strides = [1, 1]} : vector<8x384xf32> to vector<8x128xf32>
    %83 = vector.extract_strided_slice %78 {offsets = [0, 0], sizes = [8, 128], strides = [1, 1]} : vector<8x384xf32> to vector<8x128xf32>
    %84 = arith.addf %82, %83 : vector<8x128xf32>
    %85 = arith.negf %84 : vector<8x128xf32>
    %86 = math.exp %85 : vector<8x128xf32>
    %cst_22 = arith.constant 1.000000e+00 : f32
    %87 = vector.broadcast %cst_22 : f32 to vector<8x128xf32>
    %88 = arith.addf %87, %86 : vector<8x128xf32>
    %89 = arith.divf %87, %88 : vector<8x128xf32>
    %90 = vector.extract_strided_slice %81 {offsets = [0, 128], sizes = [8, 128], strides = [1, 1]} : vector<8x384xf32> to vector<8x128xf32>
    %91 = vector.extract_strided_slice %78 {offsets = [0, 128], sizes = [8, 128], strides = [1, 1]} : vector<8x384xf32> to vector<8x128xf32>
    %92 = arith.addf %90, %91 : vector<8x128xf32>
    %93 = arith.negf %92 : vector<8x128xf32>
    %94 = math.exp %93 : vector<8x128xf32>
    %cst_23 = arith.constant 1.000000e+00 : f32
    %95 = vector.broadcast %cst_23 : f32 to vector<8x128xf32>
    %96 = arith.addf %95, %94 : vector<8x128xf32>
    %97 = arith.divf %95, %96 : vector<8x128xf32>
    %98 = vector.extract_strided_slice %81 {offsets = [0, 256], sizes = [8, 128], strides = [1, 1]} : vector<8x384xf32> to vector<8x128xf32>
    %99 = vector.extract_strided_slice %78 {offsets = [0, 256], sizes = [8, 128], strides = [1, 1]} : vector<8x384xf32> to vector<8x128xf32>
    %100 = arith.addf %99, %3 : vector<8x128xf32>
    %101 = arith.mulf %89, %100 : vector<8x128xf32>
    %102 = arith.addf %98, %101 : vector<8x128xf32>
    %103 = math.tanh %102 : vector<8x128xf32>
    %cst_24 = arith.constant 1.000000e+00 : f32
    %104 = vector.broadcast %cst_24 : f32 to vector<8x128xf32>
    %105 = arith.subf %104, %97 : vector<8x128xf32>
    %106 = arith.mulf %105, %103 : vector<8x128xf32>
    %107 = arith.mulf %97, %72 : vector<8x128xf32>
    %108 = arith.addf %106, %107 : vector<8x128xf32>
    %109 = arith.index_cast %c2_i32 : i32 to index
    %c0_25 = arith.constant 0 : index
    %c0_26 = arith.constant 0 : index
    %110 = vector.load %arg3[%109, %c0_25, %c0_26] : memref<8x8x128xf32, #tpu.memory_space<vmem>>, vector<1x8x128xf32>
    %111 = vector.shape_cast %110 : vector<1x8x128xf32> to vector<8x128xf32>
    %112 = vector.shape_cast %108 : vector<8x128xf32> to vector<1x8x128xf32>
    tpu.vector_store %arg3[%109, %c0_25, %c0_26], %112 {strides = array<i32>} : memref<8x8x128xf32, #tpu.memory_space<vmem>>, vector<1x8x128xf32>,
    %c3_i32 = arith.constant 3 : i32
    %113 = arith.truncf %108 : vector<8x128xf32> to vector<8x128xbf16>
    %cst_27 = arith.constant dense<0.000000e+00> : vector<8x384xf32>
    %114 = tpu.matmul %113, %0, %cst_27 {dimension_numbers = #tpu.dot_dimension_numbers<[1], [0], [0], [1], [0, 0, 1, 1], [], []>} : vector<8x128xbf16>, vector<128x384xbf16>, vector<8x384xf32> -> vector<8x384xf32>
    %115 = arith.index_cast %c3_i32 : i32 to index
    %c0_28 = arith.constant 0 : index
    %c0_29 = arith.constant 0 : index
    %116 = vector.load %arg0[%115, %c0_28, %c0_29] : memref<8x8x384xf32, #tpu.memory_space<vmem>>, vector<1x8x384xf32>
    %117 = vector.shape_cast %116 : vector<1x8x384xf32> to vector<8x384xf32>
    %118 = vector.extract_strided_slice %117 {offsets = [0, 0], sizes = [8, 128], strides = [1, 1]} : vector<8x384xf32> to vector<8x128xf32>
    %119 = vector.extract_strided_slice %114 {offsets = [0, 0], sizes = [8, 128], strides = [1, 1]} : vector<8x384xf32> to vector<8x128xf32>
    %120 = arith.addf %118, %119 : vector<8x128xf32>
    %121 = arith.negf %120 : vector<8x128xf32>
    %122 = math.exp %121 : vector<8x128xf32>
    %cst_30 = arith.constant 1.000000e+00 : f32
    %123 = vector.broadcast %cst_30 : f32 to vector<8x128xf32>
    %124 = arith.addf %123, %122 : vector<8x128xf32>
    %125 = arith.divf %123, %124 : vector<8x128xf32>
    %126 = vector.extract_strided_slice %117 {offsets = [0, 128], sizes = [8, 128], strides = [1, 1]} : vector<8x384xf32> to vector<8x128xf32>
    %127 = vector.extract_strided_slice %114 {offsets = [0, 128], sizes = [8, 128], strides = [1, 1]} : vector<8x384xf32> to vector<8x128xf32>
    %128 = arith.addf %126, %127 : vector<8x128xf32>
    %129 = arith.negf %128 : vector<8x128xf32>
    %130 = math.exp %129 : vector<8x128xf32>
    %cst_31 = arith.constant 1.000000e+00 : f32
    %131 = vector.broadcast %cst_31 : f32 to vector<8x128xf32>
    %132 = arith.addf %131, %130 : vector<8x128xf32>
    %133 = arith.divf %131, %132 : vector<8x128xf32>
    %134 = vector.extract_strided_slice %117 {offsets = [0, 256], sizes = [8, 128], strides = [1, 1]} : vector<8x384xf32> to vector<8x128xf32>
    %135 = vector.extract_strided_slice %114 {offsets = [0, 256], sizes = [8, 128], strides = [1, 1]} : vector<8x384xf32> to vector<8x128xf32>
    %136 = arith.addf %135, %3 : vector<8x128xf32>
    %137 = arith.mulf %125, %136 : vector<8x128xf32>
    %138 = arith.addf %134, %137 : vector<8x128xf32>
    %139 = math.tanh %138 : vector<8x128xf32>
    %cst_32 = arith.constant 1.000000e+00 : f32
    %140 = vector.broadcast %cst_32 : f32 to vector<8x128xf32>
    %141 = arith.subf %140, %133 : vector<8x128xf32>
    %142 = arith.mulf %141, %139 : vector<8x128xf32>
    %143 = arith.mulf %133, %108 : vector<8x128xf32>
    %144 = arith.addf %142, %143 : vector<8x128xf32>
    %145 = arith.index_cast %c3_i32 : i32 to index
    %c0_33 = arith.constant 0 : index
    %c0_34 = arith.constant 0 : index
    %146 = vector.load %arg3[%145, %c0_33, %c0_34] : memref<8x8x128xf32, #tpu.memory_space<vmem>>, vector<1x8x128xf32>
    %147 = vector.shape_cast %146 : vector<1x8x128xf32> to vector<8x128xf32>
    %148 = vector.shape_cast %144 : vector<8x128xf32> to vector<1x8x128xf32>
    tpu.vector_store %arg3[%145, %c0_33, %c0_34], %148 {strides = array<i32>} : memref<8x8x128xf32, #tpu.memory_space<vmem>>, vector<1x8x128xf32>,
    %c4_i32 = arith.constant 4 : i32
    %149 = arith.truncf %144 : vector<8x128xf32> to vector<8x128xbf16>
    %cst_35 = arith.constant dense<0.000000e+00> : vector<8x384xf32>
    %150 = tpu.matmul %149, %0, %cst_35 {dimension_numbers = #tpu.dot_dimension_numbers<[1], [0], [0], [1], [0, 0, 1, 1], [], []>} : vector<8x128xbf16>, vector<128x384xbf16>, vector<8x384xf32> -> vector<8x384xf32>
    %151 = arith.index_cast %c4_i32 : i32 to index
    %c0_36 = arith.constant 0 : index
    %c0_37 = arith.constant 0 : index
    %152 = vector.load %arg0[%151, %c0_36, %c0_37] : memref<8x8x384xf32, #tpu.memory_space<vmem>>, vector<1x8x384xf32>
    %153 = vector.shape_cast %152 : vector<1x8x384xf32> to vector<8x384xf32>
    %154 = vector.extract_strided_slice %153 {offsets = [0, 0], sizes = [8, 128], strides = [1, 1]} : vector<8x384xf32> to vector<8x128xf32>
    %155 = vector.extract_strided_slice %150 {offsets = [0, 0], sizes = [8, 128], strides = [1, 1]} : vector<8x384xf32> to vector<8x128xf32>
    %156 = arith.addf %154, %155 : vector<8x128xf32>
    %157 = arith.negf %156 : vector<8x128xf32>
    %158 = math.exp %157 : vector<8x128xf32>
    %cst_38 = arith.constant 1.000000e+00 : f32
    %159 = vector.broadcast %cst_38 : f32 to vector<8x128xf32>
    %160 = arith.addf %159, %158 : vector<8x128xf32>
    %161 = arith.divf %159, %160 : vector<8x128xf32>
    %162 = vector.extract_strided_slice %153 {offsets = [0, 128], sizes = [8, 128], strides = [1, 1]} : vector<8x384xf32> to vector<8x128xf32>
    %163 = vector.extract_strided_slice %150 {offsets = [0, 128], sizes = [8, 128], strides = [1, 1]} : vector<8x384xf32> to vector<8x128xf32>
    %164 = arith.addf %162, %163 : vector<8x128xf32>
    %165 = arith.negf %164 : vector<8x128xf32>
    %166 = math.exp %165 : vector<8x128xf32>
    %cst_39 = arith.constant 1.000000e+00 : f32
    %167 = vector.broadcast %cst_39 : f32 to vector<8x128xf32>
    %168 = arith.addf %167, %166 : vector<8x128xf32>
    %169 = arith.divf %167, %168 : vector<8x128xf32>
    %170 = vector.extract_strided_slice %153 {offsets = [0, 256], sizes = [8, 128], strides = [1, 1]} : vector<8x384xf32> to vector<8x128xf32>
    %171 = vector.extract_strided_slice %150 {offsets = [0, 256], sizes = [8, 128], strides = [1, 1]} : vector<8x384xf32> to vector<8x128xf32>
    %172 = arith.addf %171, %3 : vector<8x128xf32>
    %173 = arith.mulf %161, %172 : vector<8x128xf32>
    %174 = arith.addf %170, %173 : vector<8x128xf32>
    %175 = math.tanh %174 : vector<8x128xf32>
    %cst_40 = arith.constant 1.000000e+00 : f32
    %176 = vector.broadcast %cst_40 : f32 to vector<8x128xf32>
    %177 = arith.subf %176, %169 : vector<8x128xf32>
    %178 = arith.mulf %177, %175 : vector<8x128xf32>
    %179 = arith.mulf %169, %144 : vector<8x128xf32>
    %180 = arith.addf %178, %179 : vector<8x128xf32>
    %181 = arith.index_cast %c4_i32 : i32 to index
    %c0_41 = arith.constant 0 : index
    %c0_42 = arith.constant 0 : index
    %182 = vector.load %arg3[%181, %c0_41, %c0_42] : memref<8x8x128xf32, #tpu.memory_space<vmem>>, vector<1x8x128xf32>
    %183 = vector.shape_cast %182 : vector<1x8x128xf32> to vector<8x128xf32>
    %184 = vector.shape_cast %180 : vector<8x128xf32> to vector<1x8x128xf32>
    tpu.vector_store %arg3[%181, %c0_41, %c0_42], %184 {strides = array<i32>} : memref<8x8x128xf32, #tpu.memory_space<vmem>>, vector<1x8x128xf32>,
    %c5_i32 = arith.constant 5 : i32
    %185 = arith.truncf %180 : vector<8x128xf32> to vector<8x128xbf16>
    %cst_43 = arith.constant dense<0.000000e+00> : vector<8x384xf32>
    %186 = tpu.matmul %185, %0, %cst_43 {dimension_numbers = #tpu.dot_dimension_numbers<[1], [0], [0], [1], [0, 0, 1, 1], [], []>} : vector<8x128xbf16>, vector<128x384xbf16>, vector<8x384xf32> -> vector<8x384xf32>
    %187 = arith.index_cast %c5_i32 : i32 to index
    %c0_44 = arith.constant 0 : index
    %c0_45 = arith.constant 0 : index
    %188 = vector.load %arg0[%187, %c0_44, %c0_45] : memref<8x8x384xf32, #tpu.memory_space<vmem>>, vector<1x8x384xf32>
    %189 = vector.shape_cast %188 : vector<1x8x384xf32> to vector<8x384xf32>
    %190 = vector.extract_strided_slice %189 {offsets = [0, 0], sizes = [8, 128], strides = [1, 1]} : vector<8x384xf32> to vector<8x128xf32>
    %191 = vector.extract_strided_slice %186 {offsets = [0, 0], sizes = [8, 128], strides = [1, 1]} : vector<8x384xf32> to vector<8x128xf32>
    %192 = arith.addf %190, %191 : vector<8x128xf32>
    %193 = arith.negf %192 : vector<8x128xf32>
    %194 = math.exp %193 : vector<8x128xf32>
    %cst_46 = arith.constant 1.000000e+00 : f32
    %195 = vector.broadcast %cst_46 : f32 to vector<8x128xf32>
    %196 = arith.addf %195, %194 : vector<8x128xf32>
    %197 = arith.divf %195, %196 : vector<8x128xf32>
    %198 = vector.extract_strided_slice %189 {offsets = [0, 128], sizes = [8, 128], strides = [1, 1]} : vector<8x384xf32> to vector<8x128xf32>
    %199 = vector.extract_strided_slice %186 {offsets = [0, 128], sizes = [8, 128], strides = [1, 1]} : vector<8x384xf32> to vector<8x128xf32>
    %200 = arith.addf %198, %199 : vector<8x128xf32>
    %201 = arith.negf %200 : vector<8x128xf32>
    %202 = math.exp %201 : vector<8x128xf32>
    %cst_47 = arith.constant 1.000000e+00 : f32
    %203 = vector.broadcast %cst_47 : f32 to vector<8x128xf32>
    %204 = arith.addf %203, %202 : vector<8x128xf32>
    %205 = arith.divf %203, %204 : vector<8x128xf32>
    %206 = vector.extract_strided_slice %189 {offsets = [0, 256], sizes = [8, 128], strides = [1, 1]} : vector<8x384xf32> to vector<8x128xf32>
    %207 = vector.extract_strided_slice %186 {offsets = [0, 256], sizes = [8, 128], strides = [1, 1]} : vector<8x384xf32> to vector<8x128xf32>
    %208 = arith.addf %207, %3 : vector<8x128xf32>
    %209 = arith.mulf %197, %208 : vector<8x128xf32>
    %210 = arith.addf %206, %209 : vector<8x128xf32>
    %211 = math.tanh %210 : vector<8x128xf32>
    %cst_48 = arith.constant 1.000000e+00 : f32
    %212 = vector.broadcast %cst_48 : f32 to vector<8x128xf32>
    %213 = arith.subf %212, %205 : vector<8x128xf32>
    %214 = arith.mulf %213, %211 : vector<8x128xf32>
    %215 = arith.mulf %205, %180 : vector<8x128xf32>
    %216 = arith.addf %214, %215 : vector<8x128xf32>
    %217 = arith.index_cast %c5_i32 : i32 to index
    %c0_49 = arith.constant 0 : index
    %c0_50 = arith.constant 0 : index
    %218 = vector.load %arg3[%217, %c0_49, %c0_50] : memref<8x8x128xf32, #tpu.memory_space<vmem>>, vector<1x8x128xf32>
    %219 = vector.shape_cast %218 : vector<1x8x128xf32> to vector<8x128xf32>
    %220 = vector.shape_cast %216 : vector<8x128xf32> to vector<1x8x128xf32>
    tpu.vector_store %arg3[%217, %c0_49, %c0_50], %220 {strides = array<i32>} : memref<8x8x128xf32, #tpu.memory_space<vmem>>, vector<1x8x128xf32>,
    %c6_i32 = arith.constant 6 : i32
    %221 = arith.truncf %216 : vector<8x128xf32> to vector<8x128xbf16>
    %cst_51 = arith.constant dense<0.000000e+00> : vector<8x384xf32>
    %222 = tpu.matmul %221, %0, %cst_51 {dimension_numbers = #tpu.dot_dimension_numbers<[1], [0], [0], [1], [0, 0, 1, 1], [], []>} : vector<8x128xbf16>, vector<128x384xbf16>, vector<8x384xf32> -> vector<8x384xf32>
    %223 = arith.index_cast %c6_i32 : i32 to index
    %c0_52 = arith.constant 0 : index
    %c0_53 = arith.constant 0 : index
    %224 = vector.load %arg0[%223, %c0_52, %c0_53] : memref<8x8x384xf32, #tpu.memory_space<vmem>>, vector<1x8x384xf32>
    %225 = vector.shape_cast %224 : vector<1x8x384xf32> to vector<8x384xf32>
    %226 = vector.extract_strided_slice %225 {offsets = [0, 0], sizes = [8, 128], strides = [1, 1]} : vector<8x384xf32> to vector<8x128xf32>
    %227 = vector.extract_strided_slice %222 {offsets = [0, 0], sizes = [8, 128], strides = [1, 1]} : vector<8x384xf32> to vector<8x128xf32>
    %228 = arith.addf %226, %227 : vector<8x128xf32>
    %229 = arith.negf %228 : vector<8x128xf32>
    %230 = math.exp %229 : vector<8x128xf32>
    %cst_54 = arith.constant 1.000000e+00 : f32
    %231 = vector.broadcast %cst_54 : f32 to vector<8x128xf32>
    %232 = arith.addf %231, %230 : vector<8x128xf32>
    %233 = arith.divf %231, %232 : vector<8x128xf32>
    %234 = vector.extract_strided_slice %225 {offsets = [0, 128], sizes = [8, 128], strides = [1, 1]} : vector<8x384xf32> to vector<8x128xf32>
    %235 = vector.extract_strided_slice %222 {offsets = [0, 128], sizes = [8, 128], strides = [1, 1]} : vector<8x384xf32> to vector<8x128xf32>
    %236 = arith.addf %234, %235 : vector<8x128xf32>
    %237 = arith.negf %236 : vector<8x128xf32>
    %238 = math.exp %237 : vector<8x128xf32>
    %cst_55 = arith.constant 1.000000e+00 : f32
    %239 = vector.broadcast %cst_55 : f32 to vector<8x128xf32>
    %240 = arith.addf %239, %238 : vector<8x128xf32>
    %241 = arith.divf %239, %240 : vector<8x128xf32>
    %242 = vector.extract_strided_slice %225 {offsets = [0, 256], sizes = [8, 128], strides = [1, 1]} : vector<8x384xf32> to vector<8x128xf32>
    %243 = vector.extract_strided_slice %222 {offsets = [0, 256], sizes = [8, 128], strides = [1, 1]} : vector<8x384xf32> to vector<8x128xf32>
    %244 = arith.addf %243, %3 : vector<8x128xf32>
    %245 = arith.mulf %233, %244 : vector<8x128xf32>
    %246 = arith.addf %242, %245 : vector<8x128xf32>
    %247 = math.tanh %246 : vector<8x128xf32>
    %cst_56 = arith.constant 1.000000e+00 : f32
    %248 = vector.broadcast %cst_56 : f32 to vector<8x128xf32>
    %249 = arith.subf %248, %241 : vector<8x128xf32>
    %250 = arith.mulf %249, %247 : vector<8x128xf32>
    %251 = arith.mulf %241, %216 : vector<8x128xf32>
    %252 = arith.addf %250, %251 : vector<8x128xf32>
    %253 = arith.index_cast %c6_i32 : i32 to index
    %c0_57 = arith.constant 0 : index
    %c0_58 = arith.constant 0 : index
    %254 = vector.load %arg3[%253, %c0_57, %c0_58] : memref<8x8x128xf32, #tpu.memory_space<vmem>>, vector<1x8x128xf32>
    %255 = vector.shape_cast %254 : vector<1x8x128xf32> to vector<8x128xf32>
    %256 = vector.shape_cast %252 : vector<8x128xf32> to vector<1x8x128xf32>
    tpu.vector_store %arg3[%253, %c0_57, %c0_58], %256 {strides = array<i32>} : memref<8x8x128xf32, #tpu.memory_space<vmem>>, vector<1x8x128xf32>,
    %c7_i32 = arith.constant 7 : i32
    %257 = arith.truncf %252 : vector<8x128xf32> to vector<8x128xbf16>
    %cst_59 = arith.constant dense<0.000000e+00> : vector<8x384xf32>
    %258 = tpu.matmul %257, %0, %cst_59 {dimension_numbers = #tpu.dot_dimension_numbers<[1], [0], [0], [1], [0, 0, 1, 1], [], []>} : vector<8x128xbf16>, vector<128x384xbf16>, vector<8x384xf32> -> vector<8x384xf32>
    %259 = arith.index_cast %c7_i32 : i32 to index
    %c0_60 = arith.constant 0 : index
    %c0_61 = arith.constant 0 : index
    %260 = vector.load %arg0[%259, %c0_60, %c0_61] : memref<8x8x384xf32, #tpu.memory_space<vmem>>, vector<1x8x384xf32>
    %261 = vector.shape_cast %260 : vector<1x8x384xf32> to vector<8x384xf32>
    %262 = vector.extract_strided_slice %261 {offsets = [0, 0], sizes = [8, 128], strides = [1, 1]} : vector<8x384xf32> to vector<8x128xf32>
    %263 = vector.extract_strided_slice %258 {offsets = [0, 0], sizes = [8, 128], strides = [1, 1]} : vector<8x384xf32> to vector<8x128xf32>
    %264 = arith.addf %262, %263 : vector<8x128xf32>
    %265 = arith.negf %264 : vector<8x128xf32>
    %266 = math.exp %265 : vector<8x128xf32>
    %cst_62 = arith.constant 1.000000e+00 : f32
    %267 = vector.broadcast %cst_62 : f32 to vector<8x128xf32>
    %268 = arith.addf %267, %266 : vector<8x128xf32>
    %269 = arith.divf %267, %268 : vector<8x128xf32>
    %270 = vector.extract_strided_slice %261 {offsets = [0, 128], sizes = [8, 128], strides = [1, 1]} : vector<8x384xf32> to vector<8x128xf32>
    %271 = vector.extract_strided_slice %258 {offsets = [0, 128], sizes = [8, 128], strides = [1, 1]} : vector<8x384xf32> to vector<8x128xf32>
    %272 = arith.addf %270, %271 : vector<8x128xf32>
    %273 = arith.negf %272 : vector<8x128xf32>
    %274 = math.exp %273 : vector<8x128xf32>
    %cst_63 = arith.constant 1.000000e+00 : f32
    %275 = vector.broadcast %cst_63 : f32 to vector<8x128xf32>
    %276 = arith.addf %275, %274 : vector<8x128xf32>
    %277 = arith.divf %275, %276 : vector<8x128xf32>
    %278 = vector.extract_strided_slice %261 {offsets = [0, 256], sizes = [8, 128], strides = [1, 1]} : vector<8x384xf32> to vector<8x128xf32>
    %279 = vector.extract_strided_slice %258 {offsets = [0, 256], sizes = [8, 128], strides = [1, 1]} : vector<8x384xf32> to vector<8x128xf32>
    %280 = arith.addf %279, %3 : vector<8x128xf32>
    %281 = arith.mulf %269, %280 : vector<8x128xf32>
    %282 = arith.addf %278, %281 : vector<8x128xf32>
    %283 = math.tanh %282 : vector<8x128xf32>
    %cst_64 = arith.constant 1.000000e+00 : f32
    %284 = vector.broadcast %cst_64 : f32 to vector<8x128xf32>
    %285 = arith.subf %284, %277 : vector<8x128xf32>
    %286 = arith.mulf %285, %283 : vector<8x128xf32>
    %287 = arith.mulf %277, %252 : vector<8x128xf32>
    %288 = arith.addf %286, %287 : vector<8x128xf32>
    %289 = arith.index_cast %c7_i32 : i32 to index
    %c0_65 = arith.constant 0 : index
    %c0_66 = arith.constant 0 : index
    %290 = vector.load %arg3[%289, %c0_65, %c0_66] : memref<8x8x128xf32, #tpu.memory_space<vmem>>, vector<1x8x128xf32>
    %291 = vector.shape_cast %290 : vector<1x8x128xf32> to vector<8x128xf32>
    %292 = vector.shape_cast %288 : vector<8x128xf32> to vector<1x8x128xf32>
    tpu.vector_store %arg3[%289, %c0_65, %c0_66], %292 {strides = array<i32>} : memref<8x8x128xf32, #tpu.memory_space<vmem>>, vector<1x8x128xf32>,
    %c8_i32 = arith.constant 8 : i32
    return
  }
}

</mosaic_0001>

<bundles_post_ra>
// kernel: tpu_custom_call.1
= control target key start
LH: loop header
LB: loop body
LE: loop exit
PB: predicated region body
PF: predicated region fallthrough
CT: control target
= control target key end

     0   :  { %8 = vsyncpa [#allocation3], 0  ;;  %s2022_s0 = inlined_call_operand.hbm [shape: f32[8,8,384], index: 0, kind: input, shape index: {}]   ;;  %s2023_s1 = inlined_call_operand.hbm [shape: bf16[128,384], index: 1, kind: input, shape index: {}]   ;;  %s2024_s2 = inlined_call_operand.vmem [shape: f32[1,128], index: 2, kind: input, shape index: {}]   ;;  %s2025_s3 = inlined_call_operand.hbm [shape: f32[8,8,128], index: 3, kind: output, shape index: {}]  }
   0x1   :  { %9 = vsyncpa [#allocation6], 0 }
   0x2   :  { %10 = vsyncpa [#allocation4], 0  ;;  %s1581_s12 = smov [#allocation2]   ;;  %s1509_s16 = scalar_lea.hbm %s2022_s0, 3072 }
   0x3   :  { %s16_s13 = sshll.u32 %s1581_s12, 4  ;;  %p1510_p0 = scmp.ne.s32.totalorder %s2022_s0, %s1509_s16  ;;  %s17_s13 = int_to_ptr.vmem [resolvable:$true] %s16_s13 }
   0x4   :  { %p1513_p1 = scmp.lt.u32.totalorder %s1509_s16, %s2022_s0 }
   0x6   :  { %p1515_p2 = pnand %p1513_p1, %p1510_p0 }
   0x8   :  { %1518 = shalt.err (!%p1515_p2)
}
   0x9   :  { %s1519_s21 = scalar_lea.vmem %s17_s13, 3072  ;;  %p1524_p4 = scmp.lt.s32.totalorder %s17_s13, %s17_s13 }
   0xa   :  { %p1520_p3 = scmp.ne.s32.totalorder %s17_s13, %s1519_s21  ;;  %p1525_p5 = scmp.lt.s32.totalorder %s1519_s21, %s1519_s21 }
   0xc   :  { %p1526_p6 = por %p1525_p5, %p1524_p4 }
   0xe   :  { %p1527_p7 = pnand %p1526_p6, %p1520_p3 }
  0x10   :  { %1530 = shalt.err (!%p1527_p7)
}
  0x11   :  { %s1582_s22 = smov 384   ;;  %s1583_s23 = smov 24  }
  0x12   :  { %22 = dma.hbm_to_vmem [thread:$0]  %s2022_s0, 3072, %s17_s13, [#allocation3], %s1582_s22, %s1582_s22, %s1583_s23  }
  0x13   :  { %s1584_s26 = smov [#allocation5]   ;;  %s1531_s30 = scalar_lea.hbm %s2023_s1, 3072 }
  0x14   :  { %s28_s27 = sshll.u32 %s1584_s26, 4  ;;  %p1532_p8 = scmp.ne.s32.totalorder %s2023_s1, %s1531_s30  ;;  %s29_s27 = int_to_ptr.vmem [resolvable:$true] %s28_s27 }
  0x15   :  { %p1535_p9 = scmp.lt.u32.totalorder %s1531_s30, %s2023_s1 }
  0x17   :  { %p1537_p10 = pnand %p1535_p9, %p1532_p8 }
  0x19   :  { %1540 = shalt.err (!%p1537_p10)
}
  0x1a   :  { %s1541_s8 = scalar_lea.vmem %s29_s27, 3072  ;;  %p1546_p12 = scmp.lt.s32.totalorder %s29_s27, %s29_s27 }
  0x1b   :  { %p1542_p11 = scmp.ne.s32.totalorder %s29_s27, %s1541_s8  ;;  %p1547_p13 = scmp.lt.s32.totalorder %s1541_s8, %s1541_s8 }
  0x1d   :  { %p1548_p0 = por %p1547_p13, %p1546_p12 }
  0x1f   :  { %p1549_p1 = pnand %p1548_p0, %p1542_p11 }
  0x21   :  { %1552 = shalt.err (!%p1549_p1)
}
  0x22   :  { %s1585_s0 = smov 192   ;;  %s1586_s9 = smov 12  }
  0x23   :  { %34 = dma.hbm_to_vmem [thread:$0]  %s2023_s1, 3072, %s29_s27, [#allocation6], %s1585_s0, %s1585_s0, %s1586_s9  }
  0x24   :  { %1575 = dma.done.wait [#allocation3], 3072  }
  0x25   :  { %1576 = vsyncadd [#allocation3], 4294964224 }
  0x26   :  { %1577 = dma.done.wait [#allocation6], 3072  }
  0x27   :  { %1578 = vsyncadd [#allocation6], 4294964224  ;;  %v1587_v0 = vmov 0.0   ;;  %v1588_v1 = vmov 0   ;;  %vm1589_vm0 = vmmov 0   ;;  %v292_v26 = vld [vmem:[#allocation2] sm:$0xff] }
  0x28   :  { %1219 = vmatprep.subr.bf16.mxu1 %v1587_v0  ;;  %243 = vmatprep.mubr.bf16.mxu0 %v1588_v1  ;;  %v1641_v2 = vld [vmem:[#allocation5 + $0x4] ss:$12 sps:$4 sm:$0xff]   ;;  %v1643_v3 = vld [vmem:[#allocation5] ss:$12 sps:$4 sm:$0xff]   ;;  %v1646_v4 = vld [vmem:[#allocation5 + $0x1c] ss:$12 sps:$4 sm:$0xff]  }
  0x29   :  { %1235 = vmatprep.mubr.msk.bf16.mxu1 %vm1589_vm0, %v1587_v0  ;;  %211 = vmatprep.subr.bf16.mxu0 %v1641_v2  ;;  %v1649_v5 = vld [vmem:[#allocation5 + $0x18] ss:$12 sps:$4 sm:$0xff]   ;;  %v1652_v6 = vld [vmem:[#allocation5 + $0x34] ss:$12 sps:$4 sm:$0xff]   ;;  %v1655_v7 = vld [vmem:[#allocation5 + $0x30] ss:$12 sps:$4 sm:$0xff]  }
  0x2a   :  { %212 = vmatpush1.bf16.msra.mxu0 %v1643_v3  ;;  %v1658_v8 = vld [vmem:[#allocation5 + $0x4c] ss:$12 sps:$4 sm:$0xff]   ;;  %v1660_v9 = vld [vmem:[#allocation5 + $0x8] ss:$12 sps:$4 sm:$0xff]   ;;  %v1667_v11 = vld [vmem:[#allocation5 + $0x64] ss:$12 sps:$4 sm:$0xff]  }
  0x2b   :  { %213 = vmatprep.subr.bf16.mxu0 %v1646_v4  ;;  %v1663_v10 = vld [vmem:[#allocation5 + $0x48] ss:$12 sps:$4 sm:$0xff]   ;;  %1220 = vmatpush3.bf16.msra.mxu1 %v1660_v9  ;;  %v1670_v12 = vld [vmem:[#allocation5 + $0x20] ss:$12 sps:$4 sm:$0xff]   ;;  %v1676_v14 = vld [vmem:[#allocation5 + $0x38] ss:$12 sps:$4 sm:$0xff]  }
  0x2c   :  { %1221 = vmatprep.subr.bf16.mxu1 %v1587_v0  ;;  %v1672_v13 = vld [vmem:[#allocation5 + $0x60] ss:$12 sps:$4 sm:$0xff]   ;;  %v1679_v15 = vld [vmem:[#allocation5 + $0x7c] ss:$12 sps:$4 sm:$0xff]   ;;  %v1683_v16 = vld [vmem:[#allocation5 + $0x78] ss:$12 sps:$4 sm:$0xff]  }
  0x2d   :  { %v1686_v17 = vld [vmem:[#allocation5 + $0x50] ss:$12 sps:$4 sm:$0xff]   ;;  %v1689_v18 = vld [vmem:[#allocation5 + $0x94] ss:$12 sps:$4 sm:$0xff]   ;;  %v1699_v21 = vld [vmem:[#allocation5 + $0xac] ss:$12 sps:$4 sm:$0xff]  }
  0x2e   :  { %214 = vmatpush1.bf16.msra.mxu0 %v1649_v5  ;;  %v1693_v19 = vld [vmem:[#allocation5 + $0x90] ss:$12 sps:$4 sm:$0xff]   ;;  %v1696_v20 = vld [vmem:[#allocation5 + $0x68] ss:$12 sps:$4 sm:$0xff]   ;;  %v1706_v23 = vld [vmem:[#allocation5 + $0x80] ss:$12 sps:$4 sm:$0xff]  }
  0x2f   :  { %215 = vmatprep.subr.bf16.mxu0 %v1652_v6  ;;  %1222 = vmatpush3.bf16.msra.mxu1 %v1670_v12  ;;  %v1703_v22 = vld [vmem:[#allocation5 + $0xa8] ss:$12 sps:$4 sm:$0xff]   ;;  %v1712_v24 = vld [vmem:[#allocation5 + $0x98] ss:$12 sps:$4 sm:$0xff]   ;;  %v1718_v25 = vld [vmem:[#allocation5 + $0xb0] ss:$12 sps:$4 sm:$0xff]  }
  0x30   :  { %1223 = vmatprep.subr.bf16.mxu1 %v1587_v0  ;;  %v293_v30 = vld [vmem:[#allocation2 + $0x8] sm:$0xff]  ;;  %v1762_v43 = vld [vmem:[%s2024_s2] ss:$0 sm:$0xff]  ;;  %v294_v47 = vld [vmem:[#allocation2 + $0x10] sm:$0xff]  ;;  %s1590_s2 = smov [#allocation7]  }
  0x31   :  { %v401_v57 = vld [vmem:[#allocation2 + $0x18] sm:$0xff]  ;;  %v402_v62 = vld [vmem:[#allocation2 + $0x20] sm:$0xff]  ;;  %s1093_s13 = sshll.u32 %s1590_s2, 4  ;;  %s1094_s13 = int_to_ptr.vmem [resolvable:$true] %s1093_s13 }
  0x32   :  { %216 = vmatpush1.bf16.msra.mxu0 %v1655_v7  ;;  %s1553_s14 = scalar_lea.vmem %s1094_s13, 1024  ;;  %p1558_p3 = scmp.lt.s32.totalorder %s1094_s13, %s1094_s13 }
  0x33   :  { %217 = vmatprep.subr.bf16.mxu0 %v1658_v8  ;;  %1224 = vmatpush3.bf16.msra.mxu1 %v1676_v14  ;;  %p1554_p2 = scmp.ne.s32.totalorder %s1094_s13, %s1553_s14  ;;  %p1559_p4 = scmp.lt.s32.totalorder %s1553_s14, %s1553_s14 }
  0x34   :  { %1225 = vmatprep.subr.bf16.mxu1 %v1587_v0 }
  0x35   :  { %p1560_p5 = por %p1559_p4, %p1558_p3 }
  0x36   :  { %218 = vmatpush1.bf16.msra.mxu0 %v1663_v10 }
  0x37   :  { %219 = vmatprep.subr.bf16.mxu0 %v1667_v11  ;;  %1226 = vmatpush3.bf16.msra.mxu1 %v1686_v17  ;;  %p1561_p6 = pnand %p1560_p5, %p1554_p2 }
  0x38   :  { %1227 = vmatprep.subr.bf16.mxu1 %v1587_v0 }
  0x3a   :  { %220 = vmatpush1.bf16.msra.mxu0 %v1672_v13 }
  0x3b   :  { %221 = vmatprep.subr.bf16.mxu0 %v1679_v15  ;;  %1228 = vmatpush3.bf16.msra.mxu1 %v1696_v20 }
  0x3c   :  { %1229 = vmatprep.subr.bf16.mxu1 %v1587_v0 }
  0x3e   :  { %222 = vmatpush1.bf16.msra.mxu0 %v1683_v16 }
  0x3f   :  { %223 = vmatprep.subr.bf16.mxu0 %v1689_v18  ;;  %1230 = vmatpush3.bf16.msra.mxu1 %v1706_v23 }
  0x40   :  { %1231 = vmatprep.subr.bf16.mxu1 %v1587_v0 }
  0x42   :  { %224 = vmatpush1.bf16.msra.mxu0 %v1693_v19 }
  0x43   :  { %225 = vmatprep.subr.bf16.mxu0 %v1699_v21  ;;  %1232 = vmatpush3.bf16.msra.mxu1 %v1712_v24 }
  0x44   :  { %1233 = vmatprep.subr.bf16.mxu1 %v1587_v0 }
  0x46   :  { %226 = vmatpush1.bf16.msra.mxu0 %v1703_v22 }
  0x47   :  { %319 = vmatprep.subr.bf16.mxu0 %v1641_v2  ;;  %1234 = vmatpush3.bf16.msra.mxu1 %v1718_v25 }
  0x48   :  { %1239 = vmatprep.subr.bf16.mxu1 %v1587_v0 }
  0x49   :  { %244 = vmatmul.mubr.bf16.vlgmr.msra.gmra.mrb[0].mxu0 %v1588_v1 }
  0x4a   :  { %320 = vmatpush1.bf16.msra.mxu0 %v1643_v3  ;;  %351 = vmatprep.mubr.bf16.mxu0 %v1588_v1 }
  0x4b   :  { %321 = vmatprep.subr.bf16.mxu0 %v1646_v4  ;;  %1236 = vmatmul.mubr.bf16.vlgmr.msra.gmra.mrb[0].mxu1 %v1588_v1 }
  0x4c   :  { %1240 = vmatpush3.bf16.msra.mxu1 %v1660_v9  ;;  %1255 = vmatprep.mubr.msk.bf16.mxu1 %vm1589_vm0, %v1587_v0 }
  0x4d   :  { %1241 = vmatprep.subr.bf16.mxu1 %v1587_v0 }
  0x4e   :  { %322 = vmatpush1.bf16.msra.mxu0 %v1649_v5 }
  0x4f   :  { %323 = vmatprep.subr.bf16.mxu0 %v1652_v6 }
  0x50   :  { %1242 = vmatpush3.bf16.msra.mxu1 %v1670_v12 }
  0x51   :  { %1243 = vmatprep.subr.bf16.mxu1 %v1587_v0 }
  0x52   :  { %324 = vmatpush1.bf16.msra.mxu0 %v1655_v7 }
  0x53   :  { %325 = vmatprep.subr.bf16.mxu0 %v1658_v8 }
  0x54   :  { %1244 = vmatpush3.bf16.msra.mxu1 %v1676_v14 }
  0x55   :  { %1245 = vmatprep.subr.bf16.mxu1 %v1587_v0 }
  0x56   :  { %326 = vmatpush1.bf16.msra.mxu0 %v1663_v10 }
  0x57   :  { %327 = vmatprep.subr.bf16.mxu0 %v1667_v11 }
  0x58   :  { %1246 = vmatpush3.bf16.msra.mxu1 %v1686_v17 }
  0x59   :  { %1247 = vmatprep.subr.bf16.mxu1 %v1587_v0 }
  0x5a   :  { %328 = vmatpush1.bf16.msra.mxu0 %v1672_v13 }
  0x5b   :  { %329 = vmatprep.subr.bf16.mxu0 %v1679_v15 }
  0x5c   :  { %1248 = vmatpush3.bf16.msra.mxu1 %v1696_v20 }
  0x5d   :  { %1249 = vmatprep.subr.bf16.mxu1 %v1587_v0 }
  0x5e   :  { %330 = vmatpush1.bf16.msra.mxu0 %v1683_v16 }
  0x5f   :  { %331 = vmatprep.subr.bf16.mxu0 %v1689_v18 }
  0x60   :  { %1250 = vmatpush3.bf16.msra.mxu1 %v1706_v23 }
  0x61   :  { %1251 = vmatprep.subr.bf16.mxu1 %v1587_v0 }
  0x62   :  { %332 = vmatpush1.bf16.msra.mxu0 %v1693_v19 }
  0x63   :  { %333 = vmatprep.subr.bf16.mxu0 %v1699_v21 }
  0x64   :  { %1252 = vmatpush3.bf16.msra.mxu1 %v1712_v24 }
  0x65   :  { %1253 = vmatprep.subr.bf16.mxu1 %v1587_v0 }
  0x66   :  { %334 = vmatpush1.bf16.msra.mxu0 %v1703_v22 }
  0x67   :  { %429 = vmatprep.subr.bf16.mxu0 %v1641_v2 }
  0x68   :  { %1254 = vmatpush3.bf16.msra.mxu1 %v1718_v25 }
  0x69   :  { %1259 = vmatprep.subr.bf16.mxu1 %v1587_v0 }
 0x11c   :  { %v245_v27 = vpop.f32.mrb[0].mxu0 }
 0x11d   :  { %v295_v28 = vadd.f32 %v292_v26, %v245_v27  ;;  %v247_v29 = vpop.f32.mrb[1].mxu0 }
 0x11e   :  { %v249_v31 = vpop.f32.mrb[2].mxu0  ;;  %v302_v34 = vadd.f32 %v293_v30, %v247_v29  ;;  %v286_v36 = vpop.f32.mrb[0].mxu1 }
 0x11f   :  { %v1131_v32 = vmul.f32 -1.442695, %v295_v28  ;;  %v250_v33 = vpop.f32.mrb[3].mxu0  ;;  %v1237_v37 = vpop.f32.mrb[1].mxu1  ;;  %v309_v45 = vadd.f32 %v1762_v43, %v286_v36 }
 0x120   :  { %v1132_v35 = vmul.f32 -1.442695, %v302_v34  ;;  %v289_v38 = vpop.f32.mrb[2].mxu1 }
 0x121   :  { %1423 = vpow2.f32 %v1131_v32  ;;  %v1238_v39 = vpop.f32.mrb[3].mxu1 }
 0x122   :  { %1425 = vpow2.f32 %v1132_v35  ;;  %v403_v39 = vld [vmem:[#allocation2 + $0x28] sm:$0xff] }
 0x12b   :  { %v1424_v40 = vpop.eup %1423 }
 0x12c   :  { %v299_v41 = vadd.f32 1.0, %v1424_v40  ;;  %v1426_v42 = vpop.eup %1425 }
 0x12d   :  { %v306_v44 = vadd.f32 1.0, %v1426_v42 }
 0x12e   :  { %1427 = vrcp.f32 %v299_v41 }
 0x12f   :  { %1429 = vrcp.f32 %v306_v44 }
 0x138   :  { %v1428_v46 = vpop.eup %1427 }
 0x139   :  { %v310_v48 = vmul.f32 %v1428_v46, %v309_v45  ;;  %v1430_v50 = vpop.eup %1429 }
 0x13a   :  { %v313_v51 = vsub.f32 1.0, %v1430_v50  ;;  %v315_v54 = vmul.f32 0.0, %v1430_v50  ;;  %v511_v50 = vld [vmem:[#allocation2 + $0x30] sm:$0xff] }
 0x13b   :  { %v311_v49 = vadd.f32 %v310_v48, %v294_v47 }
 0x13d   :  { %1431 = vtanh.f32 %v311_v49 }
 0x147   :  { %v1432_v52 = vpop.eup %1431 }
 0x148   :  { %v314_v53 = vmul.f32 %v1432_v52, %v313_v51 }
 0x14a   :  { %v1765_v55 = vadd.f32 %v315_v54, %v314_v53 }
 0x14c   :  { %317 = vst [vmem:[#allocation7] sm:$0xff] %v1765_v55  ;;  %v318_v56 = vpack.c.bf16 %v1765_v55, %v1765_v55 }
 0x14e   :  { %352 = vmatmul.mubr.bf16.vlgmr.msra.gmra.mrb[4].mxu0 %v318_v56  ;;  %1256 = vmatmul.mubr.bf16.vlgmr.msra.gmra.mrb[4].mxu1 %v318_v56 }
 0x14f   :  { %430 = vmatpush1.bf16.msra.mxu0 %v1643_v3  ;;  %1260 = vmatpush3.bf16.msra.mxu1 %v1660_v9 }
 0x150   :  { %431 = vmatprep.subr.bf16.mxu0 %v1646_v4  ;;  %1261 = vmatprep.subr.bf16.mxu1 %v1587_v0 }
 0x151   :  { %461 = vmatprep.mubr.bf16.mxu0 %v1588_v1  ;;  %1275 = vmatprep.mubr.msk.bf16.mxu1 %vm1589_vm0, %v1587_v0 }
 0x153   :  { %432 = vmatpush1.bf16.msra.mxu0 %v1649_v5  ;;  %1262 = vmatpush3.bf16.msra.mxu1 %v1670_v12 }
 0x154   :  { %433 = vmatprep.subr.bf16.mxu0 %v1652_v6  ;;  %1263 = vmatprep.subr.bf16.mxu1 %v1587_v0 }
 0x157   :  { %434 = vmatpush1.bf16.msra.mxu0 %v1655_v7  ;;  %1264 = vmatpush3.bf16.msra.mxu1 %v1676_v14 }
 0x158   :  { %435 = vmatprep.subr.bf16.mxu0 %v1658_v8  ;;  %1265 = vmatprep.subr.bf16.mxu1 %v1587_v0 }
 0x15b   :  { %436 = vmatpush1.bf16.msra.mxu0 %v1663_v10  ;;  %1266 = vmatpush3.bf16.msra.mxu1 %v1686_v17 }
 0x15c   :  { %437 = vmatprep.subr.bf16.mxu0 %v1667_v11  ;;  %1267 = vmatprep.subr.bf16.mxu1 %v1587_v0 }
 0x15f   :  { %438 = vmatpush1.bf16.msra.mxu0 %v1672_v13  ;;  %1268 = vmatpush3.bf16.msra.mxu1 %v1696_v20 }
 0x160   :  { %439 = vmatprep.subr.bf16.mxu0 %v1679_v15  ;;  %1269 = vmatprep.subr.bf16.mxu1 %v1587_v0 }
 0x163   :  { %440 = vmatpush1.bf16.msra.mxu0 %v1683_v16  ;;  %1270 = vmatpush3.bf16.msra.mxu1 %v1706_v23 }
 0x164   :  { %441 = vmatprep.subr.bf16.mxu0 %v1689_v18  ;;  %1271 = vmatprep.subr.bf16.mxu1 %v1587_v0 }
 0x167   :  { %442 = vmatpush1.bf16.msra.mxu0 %v1693_v19  ;;  %1272 = vmatpush3.bf16.msra.mxu1 %v1712_v24 }
 0x168   :  { %443 = vmatprep.subr.bf16.mxu0 %v1699_v21  ;;  %1273 = vmatprep.subr.bf16.mxu1 %v1587_v0 }
 0x16b   :  { %444 = vmatpush1.bf16.msra.mxu0 %v1703_v22  ;;  %1274 = vmatpush3.bf16.msra.mxu1 %v1718_v25 }
 0x16c   :  { %539 = vmatprep.subr.bf16.mxu0 %v1641_v2  ;;  %1279 = vmatprep.subr.bf16.mxu1 %v1587_v0 }
 0x221   :  { %v353_v58 = vpop.f32.mrb[4].mxu0  ;;  %v394_v59 = vpop.f32.mrb[4].mxu1 }
 0x222   :  { %v404_v60 = vadd.f32 %v401_v57, %v353_v58  ;;  %v355_v61 = vpop.f32.mrb[5].mxu0  ;;  %v1257_v63 = vpop.f32.mrb[5].mxu1  ;;  %v418_v37 = vadd.f32 %v1762_v43, %v394_v59 }
 0x223   :  { %v357_v26 = vpop.f32.mrb[6].mxu0  ;;  %v397_v27 = vpop.f32.mrb[6].mxu1  ;;  %v411_v31 = vadd.f32 %v402_v62, %v355_v61 }
 0x224   :  { %v1133_v28 = vmul.f32 -1.442695, %v404_v60  ;;  %v358_v29 = vpop.f32.mrb[7].mxu0  ;;  %v1258_v30 = vpop.f32.mrb[7].mxu1 }
 0x225   :  { %v1134_v32 = vmul.f32 -1.442695, %v411_v31 }
 0x226   :  { %1433 = vpow2.f32 %v1133_v28 }
 0x227   :  { %1435 = vpow2.f32 %v1134_v32  ;;  %v513_v32 = vld [vmem:[#allocation2 + $0x40] sm:$0xff] }
 0x230   :  { %v1434_v33 = vpop.eup %1433 }
 0x231   :  { %v408_v34 = vadd.f32 1.0, %v1434_v33  ;;  %v1436_v35 = vpop.eup %1435 }
 0x232   :  { %v415_v36 = vadd.f32 1.0, %v1436_v35 }
 0x233   :  { %1437 = vrcp.f32 %v408_v34 }
 0x234   :  { %1439 = vrcp.f32 %v415_v36 }
 0x23d   :  { %v1438_v38 = vpop.eup %1437 }
 0x23e   :  { %v419_v40 = vmul.f32 %v1438_v38, %v418_v37  ;;  %v1440_v42 = vpop.eup %1439 }
 0x23f   :  { %v422_v44 = vsub.f32 1.0, %v1440_v42  ;;  %v424_v47 = vmul.f32 %v1440_v42, %v1765_v55  ;;  %v512_v55 = vld [vmem:[#allocation2 + $0x38] sm:$0xff]  ;;  %v621_v42 = vld [vmem:[#allocation2 + $0x48] sm:$0xff] }
 0x240   :  { %v420_v41 = vadd.f32 %v419_v40, %v403_v39 }
 0x242   :  { %1441 = vtanh.f32 %v420_v41 }
 0x24c   :  { %v1442_v45 = vpop.eup %1441 }
 0x24d   :  { %v423_v46 = vmul.f32 %v1442_v45, %v422_v44 }
 0x24f   :  { %v1807_v48 = vadd.f32 %v424_v47, %v423_v46 }
 0x251   :  { %427 = vst [vmem:[#allocation7 + $0x8] sm:$0xff] %v1807_v48  ;;  %v428_v49 = vpack.c.bf16 %v1807_v48, %v1807_v48 }
 0x253   :  { %462 = vmatmul.mubr.bf16.vlgmr.msra.gmra.mrb[8].mxu0 %v428_v49  ;;  %1276 = vmatmul.mubr.bf16.vlgmr.msra.gmra.mrb[8].mxu1 %v428_v49 }
 0x254   :  { %540 = vmatpush1.bf16.msra.mxu0 %v1643_v3  ;;  %1280 = vmatpush3.bf16.msra.mxu1 %v1660_v9 }
 0x255   :  { %541 = vmatprep.subr.bf16.mxu0 %v1646_v4  ;;  %1281 = vmatprep.subr.bf16.mxu1 %v1587_v0 }
 0x256   :  { %571 = vmatprep.mubr.bf16.mxu0 %v1588_v1  ;;  %1295 = vmatprep.mubr.msk.bf16.mxu1 %vm1589_vm0, %v1587_v0 }
 0x258   :  { %542 = vmatpush1.bf16.msra.mxu0 %v1649_v5  ;;  %1282 = vmatpush3.bf16.msra.mxu1 %v1670_v12 }
 0x259   :  { %543 = vmatprep.subr.bf16.mxu0 %v1652_v6  ;;  %1283 = vmatprep.subr.bf16.mxu1 %v1587_v0 }
 0x25c   :  { %544 = vmatpush1.bf16.msra.mxu0 %v1655_v7  ;;  %1284 = vmatpush3.bf16.msra.mxu1 %v1676_v14 }
 0x25d   :  { %545 = vmatprep.subr.bf16.mxu0 %v1658_v8  ;;  %1285 = vmatprep.subr.bf16.mxu1 %v1587_v0 }
 0x260   :  { %546 = vmatpush1.bf16.msra.mxu0 %v1663_v10  ;;  %1286 = vmatpush3.bf16.msra.mxu1 %v1686_v17 }
 0x261   :  { %547 = vmatprep.subr.bf16.mxu0 %v1667_v11  ;;  %1287 = vmatprep.subr.bf16.mxu1 %v1587_v0 }
 0x264   :  { %548 = vmatpush1.bf16.msra.mxu0 %v1672_v13  ;;  %1288 = vmatpush3.bf16.msra.mxu1 %v1696_v20 }
 0x265   :  { %549 = vmatprep.subr.bf16.mxu0 %v1679_v15  ;;  %1289 = vmatprep.subr.bf16.mxu1 %v1587_v0 }
 0x268   :  { %550 = vmatpush1.bf16.msra.mxu0 %v1683_v16  ;;  %1290 = vmatpush3.bf16.msra.mxu1 %v1706_v23 }
 0x269   :  { %551 = vmatprep.subr.bf16.mxu0 %v1689_v18  ;;  %1291 = vmatprep.subr.bf16.mxu1 %v1587_v0 }
 0x26c   :  { %552 = vmatpush1.bf16.msra.mxu0 %v1693_v19  ;;  %1292 = vmatpush3.bf16.msra.mxu1 %v1712_v24 }
 0x26d   :  { %553 = vmatprep.subr.bf16.mxu0 %v1699_v21  ;;  %1293 = vmatprep.subr.bf16.mxu1 %v1587_v0 }
 0x270   :  { %554 = vmatpush1.bf16.msra.mxu0 %v1703_v22  ;;  %1294 = vmatpush3.bf16.msra.mxu1 %v1718_v25 }
 0x271   :  { %649 = vmatprep.subr.bf16.mxu0 %v1641_v2  ;;  %1299 = vmatprep.subr.bf16.mxu1 %v1587_v0 }
 0x326   :  { %v463_v51 = vpop.f32.mrb[8].mxu0  ;;  %v504_v52 = vpop.f32.mrb[8].mxu1 }
 0x327   :  { %v514_v53 = vadd.f32 %v511_v50, %v463_v51  ;;  %v465_v54 = vpop.f32.mrb[9].mxu0  ;;  %v1277_v56 = vpop.f32.mrb[9].mxu1  ;;  %v528_v30 = vadd.f32 %v1762_v43, %v504_v52 }
 0x328   :  { %v467_v57 = vpop.f32.mrb[10].mxu0  ;;  %v507_v58 = vpop.f32.mrb[10].mxu1  ;;  %v521_v62 = vadd.f32 %v512_v55, %v465_v54 }
 0x329   :  { %v1135_v59 = vmul.f32 -1.442695, %v514_v53  ;;  %v468_v60 = vpop.f32.mrb[11].mxu0  ;;  %v1278_v61 = vpop.f32.mrb[11].mxu1 }
 0x32a   :  { %v1136_v63 = vmul.f32 -1.442695, %v521_v62 }
 0x32b   :  { %1443 = vpow2.f32 %v1135_v59 }
 0x32c   :  { %1445 = vpow2.f32 %v1136_v63  ;;  %v623_v63 = vld [vmem:[#allocation2 + $0x58] sm:$0xff] }
 0x335   :  { %v1444_v26 = vpop.eup %1443 }
 0x336   :  { %v518_v27 = vadd.f32 1.0, %v1444_v26  ;;  %v1446_v28 = vpop.eup %1445 }
 0x337   :  { %v525_v29 = vadd.f32 1.0, %v1446_v28 }
 0x338   :  { %1447 = vrcp.f32 %v518_v27 }
 0x339   :  { %1449 = vrcp.f32 %v525_v29 }
 0x342   :  { %v1448_v31 = vpop.eup %1447 }
 0x343   :  { %v529_v33 = vmul.f32 %v1448_v31, %v528_v30  ;;  %v1450_v35 = vpop.eup %1449 }
 0x344   :  { %v532_v36 = vsub.f32 1.0, %v1450_v35  ;;  %v534_v39 = vmul.f32 %v1450_v35, %v1807_v48  ;;  %v622_v48 = vld [vmem:[#allocation2 + $0x50] sm:$0xff]  ;;  %v731_v35 = vld [vmem:[#allocation2 + $0x60] sm:$0xff] }
 0x345   :  { %v530_v34 = vadd.f32 %v529_v33, %v513_v32 }
 0x347   :  { %1451 = vtanh.f32 %v530_v34 }
 0x351   :  { %v1452_v37 = vpop.eup %1451 }
 0x352   :  { %v533_v38 = vmul.f32 %v1452_v37, %v532_v36 }
 0x354   :  { %v1849_v40 = vadd.f32 %v534_v39, %v533_v38 }
 0x356   :  { %537 = vst [vmem:[#allocation7 + $0x10] sm:$0xff] %v1849_v40  ;;  %v538_v41 = vpack.c.bf16 %v1849_v40, %v1849_v40 }
 0x358   :  { %572 = vmatmul.mubr.bf16.vlgmr.msra.gmra.mrb[12].mxu0 %v538_v41  ;;  %1296 = vmatmul.mubr.bf16.vlgmr.msra.gmra.mrb[12].mxu1 %v538_v41 }
 0x359   :  { %650 = vmatpush1.bf16.msra.mxu0 %v1643_v3  ;;  %1300 = vmatpush3.bf16.msra.mxu1 %v1660_v9 }
 0x35a   :  { %651 = vmatprep.subr.bf16.mxu0 %v1646_v4  ;;  %1301 = vmatprep.subr.bf16.mxu1 %v1587_v0 }
 0x35b   :  { %681 = vmatprep.mubr.bf16.mxu0 %v1588_v1  ;;  %1315 = vmatprep.mubr.msk.bf16.mxu1 %vm1589_vm0, %v1587_v0 }
 0x35d   :  { %652 = vmatpush1.bf16.msra.mxu0 %v1649_v5  ;;  %1302 = vmatpush3.bf16.msra.mxu1 %v1670_v12 }
 0x35e   :  { %653 = vmatprep.subr.bf16.mxu0 %v1652_v6  ;;  %1303 = vmatprep.subr.bf16.mxu1 %v1587_v0 }
 0x361   :  { %654 = vmatpush1.bf16.msra.mxu0 %v1655_v7  ;;  %1304 = vmatpush3.bf16.msra.mxu1 %v1676_v14 }
 0x362   :  { %655 = vmatprep.subr.bf16.mxu0 %v1658_v8  ;;  %1305 = vmatprep.subr.bf16.mxu1 %v1587_v0 }
 0x365   :  { %656 = vmatpush1.bf16.msra.mxu0 %v1663_v10  ;;  %1306 = vmatpush3.bf16.msra.mxu1 %v1686_v17 }
 0x366   :  { %657 = vmatprep.subr.bf16.mxu0 %v1667_v11  ;;  %1307 = vmatprep.subr.bf16.mxu1 %v1587_v0 }
 0x369   :  { %658 = vmatpush1.bf16.msra.mxu0 %v1672_v13  ;;  %1308 = vmatpush3.bf16.msra.mxu1 %v1696_v20 }
 0x36a   :  { %659 = vmatprep.subr.bf16.mxu0 %v1679_v15  ;;  %1309 = vmatprep.subr.bf16.mxu1 %v1587_v0 }
 0x36d   :  { %660 = vmatpush1.bf16.msra.mxu0 %v1683_v16  ;;  %1310 = vmatpush3.bf16.msra.mxu1 %v1706_v23 }
 0x36e   :  { %661 = vmatprep.subr.bf16.mxu0 %v1689_v18  ;;  %1311 = vmatprep.subr.bf16.mxu1 %v1587_v0 }
 0x371   :  { %662 = vmatpush1.bf16.msra.mxu0 %v1693_v19  ;;  %1312 = vmatpush3.bf16.msra.mxu1 %v1712_v24 }
 0x372   :  { %663 = vmatprep.subr.bf16.mxu0 %v1699_v21  ;;  %1313 = vmatprep.subr.bf16.mxu1 %v1587_v0 }
 0x375   :  { %664 = vmatpush1.bf16.msra.mxu0 %v1703_v22  ;;  %1314 = vmatpush3.bf16.msra.mxu1 %v1718_v25 }
 0x376   :  { %759 = vmatprep.subr.bf16.mxu0 %v1641_v2  ;;  %1319 = vmatprep.subr.bf16.mxu1 %v1587_v0 }
 0x42b   :  { %v573_v44 = vpop.f32.mrb[12].mxu0  ;;  %v614_v45 = vpop.f32.mrb[12].mxu1 }
 0x42c   :  { %v624_v46 = vadd.f32 %v621_v42, %v573_v44  ;;  %v575_v47 = vpop.f32.mrb[13].mxu0  ;;  %v1297_v49 = vpop.f32.mrb[13].mxu1  ;;  %v638_v61 = vadd.f32 %v1762_v43, %v614_v45 }
 0x42d   :  { %v577_v50 = vpop.f32.mrb[14].mxu0  ;;  %v617_v51 = vpop.f32.mrb[14].mxu1  ;;  %v631_v55 = vadd.f32 %v622_v48, %v575_v47 }
 0x42e   :  { %v1137_v52 = vmul.f32 -1.442695, %v624_v46  ;;  %v578_v53 = vpop.f32.mrb[15].mxu0  ;;  %v1298_v54 = vpop.f32.mrb[15].mxu1 }
 0x42f   :  { %v1138_v56 = vmul.f32 -1.442695, %v631_v55 }
 0x430   :  { %1453 = vpow2.f32 %v1137_v52 }
 0x431   :  { %1455 = vpow2.f32 %v1138_v56  ;;  %v733_v56 = vld [vmem:[#allocation2 + $0x70] sm:$0xff] }
 0x43a   :  { %v1454_v57 = vpop.eup %1453 }
 0x43b   :  { %v628_v58 = vadd.f32 1.0, %v1454_v57  ;;  %v1456_v59 = vpop.eup %1455 }
 0x43c   :  { %v635_v60 = vadd.f32 1.0, %v1456_v59 }
 0x43d   :  { %1457 = vrcp.f32 %v628_v58 }
 0x43e   :  { %1459 = vrcp.f32 %v635_v60 }
 0x447   :  { %v1458_v62 = vpop.eup %1457 }
 0x448   :  { %v639_v26 = vmul.f32 %v1458_v62, %v638_v61  ;;  %v1460_v28 = vpop.eup %1459 }
 0x449   :  { %v642_v29 = vsub.f32 1.0, %v1460_v28  ;;  %v644_v32 = vmul.f32 %v1460_v28, %v1849_v40  ;;  %v732_v40 = vld [vmem:[#allocation2 + $0x68] sm:$0xff] }
 0x44a   :  { %v640_v27 = vadd.f32 %v639_v26, %v623_v63 }
 0x44c   :  { %1461 = vtanh.f32 %v640_v27 }
 0x456   :  { %v1462_v30 = vpop.eup %1461 }
 0x457   :  { %v643_v31 = vmul.f32 %v1462_v30, %v642_v29 }
 0x459   :  { %v1891_v33 = vadd.f32 %v644_v32, %v643_v31 }
 0x45b   :  { %647 = vst [vmem:[#allocation7 + $0x18] sm:$0xff] %v1891_v33  ;;  %v648_v34 = vpack.c.bf16 %v1891_v33, %v1891_v33 }
 0x45d   :  { %682 = vmatmul.mubr.bf16.vlgmr.msra.gmra.mrb[16].mxu0 %v648_v34  ;;  %1316 = vmatmul.mubr.bf16.vlgmr.msra.gmra.mrb[16].mxu1 %v648_v34 }
 0x45e   :  { %760 = vmatpush1.bf16.msra.mxu0 %v1643_v3  ;;  %1320 = vmatpush3.bf16.msra.mxu1 %v1660_v9 }
 0x45f   :  { %761 = vmatprep.subr.bf16.mxu0 %v1646_v4  ;;  %1321 = vmatprep.subr.bf16.mxu1 %v1587_v0 }
 0x460   :  { %791 = vmatprep.mubr.bf16.mxu0 %v1588_v1  ;;  %1335 = vmatprep.mubr.msk.bf16.mxu1 %vm1589_vm0, %v1587_v0 }
 0x462   :  { %762 = vmatpush1.bf16.msra.mxu0 %v1649_v5  ;;  %1322 = vmatpush3.bf16.msra.mxu1 %v1670_v12 }
 0x463   :  { %763 = vmatprep.subr.bf16.mxu0 %v1652_v6  ;;  %1323 = vmatprep.subr.bf16.mxu1 %v1587_v0 }
 0x466   :  { %764 = vmatpush1.bf16.msra.mxu0 %v1655_v7  ;;  %1324 = vmatpush3.bf16.msra.mxu1 %v1676_v14 }
 0x467   :  { %765 = vmatprep.subr.bf16.mxu0 %v1658_v8  ;;  %1325 = vmatprep.subr.bf16.mxu1 %v1587_v0 }
 0x46a   :  { %766 = vmatpush1.bf16.msra.mxu0 %v1663_v10  ;;  %1326 = vmatpush3.bf16.msra.mxu1 %v1686_v17 }
 0x46b   :  { %767 = vmatprep.subr.bf16.mxu0 %v1667_v11  ;;  %1327 = vmatprep.subr.bf16.mxu1 %v1587_v0 }
 0x46e   :  { %768 = vmatpush1.bf16.msra.mxu0 %v1672_v13  ;;  %1328 = vmatpush3.bf16.msra.mxu1 %v1696_v20 }
 0x46f   :  { %769 = vmatprep.subr.bf16.mxu0 %v1679_v15  ;;  %1329 = vmatprep.subr.bf16.mxu1 %v1587_v0 }
 0x472   :  { %770 = vmatpush1.bf16.msra.mxu0 %v1683_v16  ;;  %1330 = vmatpush3.bf16.msra.mxu1 %v1706_v23 }
 0x473   :  { %771 = vmatprep.subr.bf16.mxu0 %v1689_v18  ;;  %1331 = vmatprep.subr.bf16.mxu1 %v1587_v0 }
 0x476   :  { %772 = vmatpush1.bf16.msra.mxu0 %v1693_v19  ;;  %1332 = vmatpush3.bf16.msra.mxu1 %v1712_v24 }
 0x477   :  { %773 = vmatprep.subr.bf16.mxu0 %v1699_v21  ;;  %1333 = vmatprep.subr.bf16.mxu1 %v1587_v0 }
 0x47a   :  { %774 = vmatpush1.bf16.msra.mxu0 %v1703_v22  ;;  %1334 = vmatpush3.bf16.msra.mxu1 %v1718_v25 }
 0x47b   :  { %869 = vmatprep.subr.bf16.mxu0 %v1641_v2  ;;  %1339 = vmatprep.subr.bf16.mxu1 %v1587_v0 }
 0x530   :  { %v683_v36 = vpop.f32.mrb[16].mxu0  ;;  %v724_v37 = vpop.f32.mrb[16].mxu1 }
 0x531   :  { %v734_v38 = vadd.f32 %v731_v35, %v683_v36  ;;  %v685_v39 = vpop.f32.mrb[17].mxu0  ;;  %v1317_v41 = vpop.f32.mrb[17].mxu1  ;;  %v748_v54 = vadd.f32 %v1762_v43, %v724_v37 }
 0x532   :  { %v687_v42 = vpop.f32.mrb[18].mxu0  ;;  %v727_v44 = vpop.f32.mrb[18].mxu1  ;;  %v741_v48 = vadd.f32 %v732_v40, %v685_v39  ;;  %v843_v41 = vld [vmem:[#allocation2 + $0x88] sm:$0xff] }
 0x533   :  { %v1139_v45 = vmul.f32 -1.442695, %v734_v38  ;;  %v688_v46 = vpop.f32.mrb[19].mxu0  ;;  %v1318_v47 = vpop.f32.mrb[19].mxu1 }
 0x534   :  { %v1140_v49 = vmul.f32 -1.442695, %v741_v48 }
 0x535   :  { %1463 = vpow2.f32 %v1139_v45 }
 0x536   :  { %1465 = vpow2.f32 %v1140_v49 }
 0x53f   :  { %v1464_v50 = vpop.eup %1463 }
 0x540   :  { %v738_v51 = vadd.f32 1.0, %v1464_v50  ;;  %v1466_v52 = vpop.eup %1465 }
 0x541   :  { %v745_v53 = vadd.f32 1.0, %v1466_v52  ;;  %v1503_v52 = vld [vmem:[#allocation5] ss:$12 sps:$4 sm:$0xff]  }
 0x542   :  { %1467 = vrcp.f32 %v738_v51 }
 0x543   :  { %1469 = vrcp.f32 %v745_v53  ;;  %v1504_v53 = vld [vmem:[#allocation5 + $0x1c] ss:$12 sps:$4 sm:$0xff]  }
 0x54c   :  { %v1468_v55 = vpop.eup %1467 }
 0x54d   :  { %v749_v57 = vmul.f32 %v1468_v55, %v748_v54  ;;  %v1470_v59 = vpop.eup %1469  ;;  %v1505_v54 = vld [vmem:[#allocation5 + $0x18] ss:$12 sps:$4 sm:$0xff]   ;;  %v1506_v55 = vld [vmem:[#allocation5 + $0x34] ss:$12 sps:$4 sm:$0xff]  }
 0x54e   :  { %v752_v60 = vsub.f32 1.0, %v1470_v59  ;;  %v754_v63 = vmul.f32 %v1470_v59, %v1891_v33  ;;  %v953_v59 = vld [vmem:[#allocation2 + $0xa0] sm:$0xff] }
 0x54f   :  { %v750_v58 = vadd.f32 %v749_v57, %v733_v56  ;;  %v1507_v56 = vld [vmem:[#allocation5 + $0x30] ss:$12 sps:$4 sm:$0xff]  }
 0x551   :  { %1471 = vtanh.f32 %v750_v58 }
 0x55b   :  { %v1472_v61 = vpop.eup %1471 }
 0x55c   :  { %v753_v62 = vmul.f32 %v1472_v61, %v752_v60 }
 0x55e   :  { %v1933_v26 = vadd.f32 %v754_v63, %v753_v62 }
 0x560   :  { %757 = vst [vmem:[#allocation7 + $0x20] sm:$0xff] %v1933_v26  ;;  %v758_v27 = vpack.c.bf16 %v1933_v26, %v1933_v26 }
 0x562   :  { %792 = vmatmul.mubr.bf16.vlgmr.msra.gmra.mrb[20].mxu0 %v758_v27  ;;  %1336 = vmatmul.mubr.bf16.vlgmr.msra.gmra.mrb[20].mxu1 %v758_v27 }
 0x563   :  { %870 = vmatpush1.bf16.msra.mxu0 %v1643_v3  ;;  %1340 = vmatpush3.bf16.msra.mxu1 %v1660_v9  ;;  %v841_v3 = vld [vmem:[#allocation2 + $0x78] sm:$0xff] }
 0x564   :  { %871 = vmatprep.subr.bf16.mxu0 %v1646_v4  ;;  %1341 = vmatprep.subr.bf16.mxu1 %v1587_v0 }
 0x565   :  { %901 = vmatprep.mubr.bf16.mxu0 %v1588_v1  ;;  %1355 = vmatprep.mubr.msk.bf16.mxu1 %vm1589_vm0, %v1587_v0 }
 0x567   :  { %872 = vmatpush1.bf16.msra.mxu0 %v1649_v5  ;;  %1342 = vmatpush3.bf16.msra.mxu1 %v1670_v12 }
 0x568   :  { %873 = vmatprep.subr.bf16.mxu0 %v1652_v6  ;;  %1343 = vmatprep.subr.bf16.mxu1 %v1587_v0 }
 0x56b   :  { %874 = vmatpush1.bf16.msra.mxu0 %v1655_v7  ;;  %1344 = vmatpush3.bf16.msra.mxu1 %v1676_v14 }
 0x56c   :  { %875 = vmatprep.subr.bf16.mxu0 %v1658_v8  ;;  %1345 = vmatprep.subr.bf16.mxu1 %v1587_v0  ;;  %v842_v8 = vld [vmem:[#allocation2 + $0x80] sm:$0xff] }
 0x56f   :  { %876 = vmatpush1.bf16.msra.mxu0 %v1663_v10  ;;  %1346 = vmatpush3.bf16.msra.mxu1 %v1686_v17 }
 0x570   :  { %877 = vmatprep.subr.bf16.mxu0 %v1667_v11  ;;  %1347 = vmatprep.subr.bf16.mxu1 %v1587_v0 }
 0x573   :  { %878 = vmatpush1.bf16.msra.mxu0 %v1672_v13  ;;  %1348 = vmatpush3.bf16.msra.mxu1 %v1696_v20 }
 0x574   :  { %879 = vmatprep.subr.bf16.mxu0 %v1679_v15  ;;  %1349 = vmatprep.subr.bf16.mxu1 %v1587_v0 }
 0x577   :  { %880 = vmatpush1.bf16.msra.mxu0 %v1683_v16  ;;  %1350 = vmatpush3.bf16.msra.mxu1 %v1706_v23 }
 0x578   :  { %881 = vmatprep.subr.bf16.mxu0 %v1689_v18  ;;  %1351 = vmatprep.subr.bf16.mxu1 %v1587_v0 }
 0x57b   :  { %882 = vmatpush1.bf16.msra.mxu0 %v1693_v19  ;;  %1352 = vmatpush3.bf16.msra.mxu1 %v1712_v24 }
 0x57c   :  { %883 = vmatprep.subr.bf16.mxu0 %v1699_v21  ;;  %1353 = vmatprep.subr.bf16.mxu1 %v1587_v0 }
 0x57f   :  { %884 = vmatpush1.bf16.msra.mxu0 %v1703_v22  ;;  %1354 = vmatpush3.bf16.msra.mxu1 %v1718_v25 }
 0x580   :  { %979 = vmatprep.subr.bf16.mxu0 %v1641_v2  ;;  %1359 = vmatprep.subr.bf16.mxu1 %v1587_v0 }
 0x635   :  { %v793_v4 = vpop.f32.mrb[20].mxu0  ;;  %v834_v5 = vpop.f32.mrb[20].mxu1 }
 0x636   :  { %v844_v6 = vadd.f32 %v841_v3, %v793_v4  ;;  %v795_v7 = vpop.f32.mrb[21].mxu0  ;;  %v1337_v28 = vpop.f32.mrb[21].mxu1  ;;  %v858_v39 = vadd.f32 %v1762_v43, %v834_v5 }
 0x637   :  { %v797_v29 = vpop.f32.mrb[22].mxu0  ;;  %v837_v30 = vpop.f32.mrb[22].mxu1  ;;  %v851_v34 = vadd.f32 %v842_v8, %v795_v7 }
 0x638   :  { %v1141_v31 = vmul.f32 -1.442695, %v844_v6  ;;  %v798_v32 = vpop.f32.mrb[23].mxu0  ;;  %v1338_v33 = vpop.f32.mrb[23].mxu1  ;;  %v1061_v6 = vld [vmem:[#allocation2 + $0xa8] sm:$0xff]  ;;  %v1062_v30 = vld [vmem:[#allocation2 + $0xb0] sm:$0xff] }
 0x639   :  { %v1142_v35 = vmul.f32 -1.442695, %v851_v34 }
 0x63a   :  { %1473 = vpow2.f32 %v1141_v31 }
 0x63b   :  { %1475 = vpow2.f32 %v1142_v35 }
 0x644   :  { %v1474_v36 = vpop.eup %1473 }
 0x645   :  { %v848_v2 = vadd.f32 1.0, %v1474_v36  ;;  %v1476_v37 = vpop.eup %1475 }
 0x646   :  { %v855_v38 = vadd.f32 1.0, %v1476_v37 }
 0x647   :  { %1477 = vrcp.f32 %v848_v2 }
 0x648   :  { %1479 = vrcp.f32 %v855_v38 }
 0x651   :  { %v1478_v40 = vpop.eup %1477 }
 0x652   :  { %v859_v42 = vmul.f32 %v1478_v40, %v858_v39  ;;  %v1480_v45 = vpop.eup %1479 }
 0x653   :  { %v862_v46 = vsub.f32 1.0, %v1480_v45  ;;  %v864_v49 = vmul.f32 %v1480_v45, %v1933_v26  ;;  %v1063_v45 = vld [vmem:[#allocation2 + $0xb8] sm:$0xff] }
 0x654   :  { %v860_v44 = vadd.f32 %v859_v42, %v843_v41 }
 0x656   :  { %1481 = vtanh.f32 %v860_v44 }
 0x660   :  { %v1482_v47 = vpop.eup %1481 }
 0x661   :  { %v863_v48 = vmul.f32 %v1482_v47, %v862_v46 }
 0x663   :  { %v1975_v50 = vadd.f32 %v864_v49, %v863_v48 }
 0x665   :  { %867 = vst [vmem:[#allocation7 + $0x28] sm:$0xff] %v1975_v50  ;;  %v868_v51 = vpack.c.bf16 %v1975_v50, %v1975_v50 }
 0x667   :  { %902 = vmatmul.mubr.bf16.vlgmr.msra.gmra.mrb[24].mxu0 %v868_v51  ;;  %1356 = vmatmul.mubr.bf16.vlgmr.msra.gmra.mrb[24].mxu1 %v868_v51 }
 0x668   :  { %980 = vmatpush1.bf16.msra.mxu0 %v1503_v52  ;;  %1360 = vmatpush3.bf16.msra.mxu1 %v1660_v9  ;;  %v1508_v9 = vld [vmem:[#allocation5 + $0x4c] ss:$12 sps:$4 sm:$0xff]  }
 0x669   :  { %981 = vmatprep.subr.bf16.mxu0 %v1504_v53  ;;  %1361 = vmatprep.subr.bf16.mxu1 %v1587_v0 }
 0x66a   :  { %1011 = vmatprep.mubr.bf16.mxu0 %v1588_v1  ;;  %1375 = vmatprep.mubr.msk.bf16.mxu1 %vm1589_vm0, %v1587_v0  ;;  %v951_v1 = vld [vmem:[#allocation2 + $0x90] sm:$0xff] }
 0x66c   :  { %982 = vmatpush1.bf16.msra.mxu0 %v1505_v54  ;;  %1362 = vmatpush3.bf16.msra.mxu1 %v1670_v12 }
 0x66d   :  { %983 = vmatprep.subr.bf16.mxu0 %v1506_v55  ;;  %1363 = vmatprep.subr.bf16.mxu1 %v1587_v0 }
 0x670   :  { %984 = vmatpush1.bf16.msra.mxu0 %v1507_v56  ;;  %1364 = vmatpush3.bf16.msra.mxu1 %v1676_v14  ;;  %v952_v14 = vld [vmem:[#allocation2 + $0x98] sm:$0xff] }
 0x671   :  { %985 = vmatprep.subr.bf16.mxu0 %v1508_v9  ;;  %1365 = vmatprep.subr.bf16.mxu1 %v1587_v0 }
 0x674   :  { %986 = vmatpush1.bf16.msra.mxu0 %v1663_v10  ;;  %1366 = vmatpush3.bf16.msra.mxu1 %v1686_v17 }
 0x675   :  { %987 = vmatprep.subr.bf16.mxu0 %v1667_v11  ;;  %1367 = vmatprep.subr.bf16.mxu1 %v1587_v0 }
 0x678   :  { %988 = vmatpush1.bf16.msra.mxu0 %v1672_v13  ;;  %1368 = vmatpush3.bf16.msra.mxu1 %v1696_v20 }
 0x679   :  { %989 = vmatprep.subr.bf16.mxu0 %v1679_v15  ;;  %1369 = vmatprep.subr.bf16.mxu1 %v1587_v0 }
 0x67c   :  { %990 = vmatpush1.bf16.msra.mxu0 %v1683_v16  ;;  %1370 = vmatpush3.bf16.msra.mxu1 %v1706_v23 }
 0x67d   :  { %991 = vmatprep.subr.bf16.mxu0 %v1689_v18  ;;  %1371 = vmatprep.subr.bf16.mxu1 %v1587_v0 }
 0x680   :  { %992 = vmatpush1.bf16.msra.mxu0 %v1693_v19  ;;  %1372 = vmatpush3.bf16.msra.mxu1 %v1712_v24 }
 0x681   :  { %993 = vmatprep.subr.bf16.mxu0 %v1699_v21  ;;  %1373 = vmatprep.subr.bf16.mxu1 %v1587_v0 }
 0x684   :  { %994 = vmatpush1.bf16.msra.mxu0 %v1703_v22  ;;  %1374 = vmatpush3.bf16.msra.mxu1 %v1718_v25 }
 0x73a   :  { %v903_v10 = vpop.f32.mrb[24].mxu0  ;;  %v944_v11 = vpop.f32.mrb[24].mxu1 }
 0x73b   :  { %v954_v12 = vadd.f32 %v951_v1, %v903_v10  ;;  %v905_v13 = vpop.f32.mrb[25].mxu0  ;;  %v1357_v15 = vpop.f32.mrb[25].mxu1  ;;  %v968_v57 = vadd.f32 %v1762_v43, %v944_v11 }
 0x73c   :  { %v907_v16 = vpop.f32.mrb[26].mxu0  ;;  %v947_v17 = vpop.f32.mrb[26].mxu1  ;;  %v961_v23 = vadd.f32 %v952_v14, %v905_v13 }
 0x73d   :  { %v1143_v18 = vmul.f32 -1.442695, %v954_v12  ;;  %v908_v19 = vpop.f32.mrb[27].mxu0  ;;  %v1358_v20 = vpop.f32.mrb[27].mxu1 }
 0x73e   :  { %v1144_v21 = vmul.f32 -1.442695, %v961_v23 }
 0x73f   :  { %1483 = vpow2.f32 %v1143_v18 }
 0x740   :  { %1485 = vpow2.f32 %v1144_v21 }
 0x749   :  { %v1484_v0 = vpop.eup %1483 }
 0x74a   :  { %v958_v22 = vadd.f32 1.0, %v1484_v0  ;;  %v1486_v24 = vpop.eup %1485 }
 0x74b   :  { %v965_v25 = vadd.f32 1.0, %v1486_v24 }
 0x74c   :  { %1487 = vrcp.f32 %v958_v22 }
 0x74d   :  { %1489 = vrcp.f32 %v965_v25 }
 0x756   :  { %v1488_v58 = vpop.eup %1487 }
 0x757   :  { %v969_v60 = vmul.f32 %v1488_v58, %v968_v57  ;;  %v1490_v62 = vpop.eup %1489 }
 0x758   :  { %v972_v63 = vsub.f32 1.0, %v1490_v62  ;;  %v974_v3 = vmul.f32 %v1490_v62, %v1975_v50 }
 0x759   :  { %v970_v61 = vadd.f32 %v969_v60, %v953_v59 }
 0x75b   :  { %1491 = vtanh.f32 %v970_v61 }
 0x765   :  { %v1492_v26 = vpop.eup %1491 }
 0x766   :  { %v973_v27 = vmul.f32 %v1492_v26, %v972_v63 }
 0x768   :  { %v975_v4 = vadd.f32 %v974_v3, %v973_v27 }
 0x76a   :  { %977 = vst [vmem:[#allocation7 + $0x30] sm:$0xff] %v975_v4  ;;  %v978_v5 = vpack.c.bf16 %v975_v4, %v975_v4 }
 0x76c   :  { %1012 = vmatmul.mubr.bf16.vlgmr.msra.gmra.mrb[28].mxu0 %v978_v5  ;;  %1376 = vmatmul.mubr.bf16.vlgmr.msra.gmra.mrb[28].mxu1 %v978_v5 }
 0x83f   :  { %v1013_v7 = vpop.f32.mrb[28].mxu0  ;;  %v1054_v8 = vpop.f32.mrb[28].mxu1 }
 0x840   :  { %v1064_v28 = vadd.f32 %v1061_v6, %v1013_v7  ;;  %v1015_v29 = vpop.f32.mrb[29].mxu0  ;;  %v1377_v31 = vpop.f32.mrb[29].mxu1  ;;  %v1078_v42 = vadd.f32 %v1762_v43, %v1054_v8 }
 0x841   :  { %v1017_v32 = vpop.f32.mrb[30].mxu0  ;;  %v1057_v33 = vpop.f32.mrb[30].mxu1  ;;  %v1071_v2 = vadd.f32 %v1062_v30, %v1015_v29 }
 0x842   :  { %v1145_v34 = vmul.f32 -1.442695, %v1064_v28  ;;  %v1018_v35 = vpop.f32.mrb[31].mxu0  ;;  %v1378_v36 = vpop.f32.mrb[31].mxu1 }
 0x843   :  { %v1146_v37 = vmul.f32 -1.442695, %v1071_v2 }
 0x844   :  { %1493 = vpow2.f32 %v1145_v34 }
 0x845   :  { %1495 = vpow2.f32 %v1146_v37 }
 0x84e   :  { %v1494_v38 = vpop.eup %1493 }
 0x84f   :  { %v1068_v39 = vadd.f32 1.0, %v1494_v38  ;;  %v1496_v40 = vpop.eup %1495 }
 0x850   :  { %v1075_v41 = vadd.f32 1.0, %v1496_v40 }
 0x851   :  { %1497 = vrcp.f32 %v1068_v39 }
 0x852   :  { %1499 = vrcp.f32 %v1075_v41 }
 0x85b   :  { %v1498_v44 = vpop.eup %1497 }
 0x85c   :  { %v1079_v46 = vmul.f32 %v1498_v44, %v1078_v42  ;;  %v1500_v48 = vpop.eup %1499 }
 0x85d   :  { %v1082_v49 = vsub.f32 1.0, %v1500_v48  ;;  %v1084_v52 = vmul.f32 %v1500_v48, %v975_v4 }
 0x85e   :  { %v1080_v47 = vadd.f32 %v1079_v46, %v1063_v45 }
 0x860   :  { %1501 = vtanh.f32 %v1080_v47 }
 0x86a   :  { %v1502_v50 = vpop.eup %1501 }
 0x86b   :  { %v1083_v51 = vmul.f32 %v1502_v50, %v1082_v49 }
 0x86d   :  { %v1085_v53 = vadd.f32 %v1084_v52, %v1083_v51 }
 0x86f   :  { %1087 = vst [vmem:[#allocation7 + $0x38] sm:$0xff] %v1085_v53 }
 0x870   :  { %1564 = shalt.err (!%p1561_p6)
}
 0x871   :  { %s1565_s17 = scalar_lea.hbm %s2025_s3, 1024 }
 0x872   :  { %p1566_p7 = scmp.ne.s32.totalorder %s2025_s3, %s1565_s17  ;;  %p1569_p8 = scmp.lt.u32.totalorder %s1565_s17, %s2025_s3 }
 0x874   :  { %p1571_p9 = pnand %p1569_p8, %p1566_p7 }
 0x876   :  { %1574 = shalt.err (!%p1571_p9)
}
 0x877   :  { %s1591_s22 = smov 128   ;;  %s1592_s23 = smov 8  }
 0x878   :  { %1099 = dma.vmem_to_hbm [thread:$0]  %s1094_s13, 1024, %s2025_s3, [#allocation4], %s1591_s22, %s1591_s22, %s1592_s23  }
 0x879   :  { %1579 = dma.done.wait [#allocation4], 1024  }
 0x87a   :  { %1580 = vsyncadd [#allocation4], 4294966272 }
 0x87b   :  { %1103 = vsyncpa [#allocation3], 1 }
 0x87c   :  { %1104 = vsyncpa [#allocation6], 1 }
 0x87d   :  { %1105 = vsyncpa [#allocation4], 1 }

</bundles_post_ra>
